<compile_context>
chip_gen: v6e
topology: v6e:2x2x1
jax: 0.10.0
libtpu: 0.0.40
codegen_flags: <defaults>
</compile_context>

<pallas_src>
import functools

import jax
import jax.numpy as jnp
import numpy as np
from jax import lax
from jax.experimental import pallas as pl
from jax.experimental.pallas import tpu as pltpu


def _pick_channel_band(chid):
  # Largest band (multiple of 16, for bf16 sublane packing of the weight slices)
  # dividing Chid, capped at 64 rows so h/hs/tap/acc stay well under 64 vregs even
  # with a 512-wide lane axis.  Falls back to a single band.
  for cb in (64, 48, 32, 16):
    if chid >= cb and chid % cb == 0:
      return cb
  return chid


def _default_grid_steps(batch):
  # v7x has 2 TensorCores per chip: keep 2 parallel grid steps there.
  # Single-TC v5e/v6e (and emulation): merge the whole batch into one step.
  try:
    kind = jax.devices()[0].device_kind.lower()
  except Exception:
    kind = ""
  if "v7" in kind and batch % 2 == 0:
    return 2
  return 1


def _inverted_residual_kernel(*refs, H, W, images, expand, shortcut, band):
  """Fused expand(1x1)->ReLU6->dw3x3->ReLU6->project(1x1)[+x], channel-major."""
  if expand:
    x_ref, w1_ref, b1_ref, wdw_ref, b2_ref, w3t_ref, b3_ref, o_ref = refs
  else:
    x_ref, wdw_ref, b2_ref, w3t_ref, b3_ref, o_ref = refs

  HW = H * W
  L = images * HW                     # merged lane axis: [img0 pixels | img1 ...]
  x = x_ref[0]                        # (Cin, L); f32 (bf16 for no-shortcut expand blocks)

  # Per-image border masks (p % HW so merged images never bleed into each other
  # through the lane rotations).
  p = lax.broadcasted_iota(jnp.int32, (1, L), 1)
  pp = p % HW
  ow = pp % W
  not_left = ow > 0                   # column ow-1 exists (dj == 0 taps)
  not_right = ow < (W - 1)            # column ow+1 exists (dj == 2 taps)
  not_top = pp >= W                   # row above exists   (di == 0 taps)
  not_bot = pp < (HW - W)             # row below exists   (di == 2 taps)

  if expand:
    x_mm = x.astype(jnp.bfloat16)     # no-op when the wrapper already passed bf16

  cout = o_ref.shape[1]
  chid = wdw_ref.shape[1]
  nbands = chid // band

  def band_step(c0, y):
    sl = pl.ds(c0, band)
    # ---- Stage 1: 1x1 expand (+folded BN) + ReLU6 on the MXU (bf16 x bf16 -> f32).
    if expand:
      hb = jnp.dot(w1_ref[sl], x_mm, preferred_element_type=jnp.float32)
      hb = jnp.clip(hb + b1_ref[sl], 0.0, 6.0)          # (band, L)
    else:
      hb = x                                            # Chid == Cin, single band
    # ---- Stage 2: depthwise 3x3 (padding=1), in-register lane rolls.
    # pltpu.roll needs non-negative shifts: "shift by -k" == "shift by L-k".
    # Accumulator starts at the folded-BN bias (saves one full add pass).
    acc = jnp.broadcast_to(b2_ref[sl], (band, L)).astype(jnp.float32)
    for dj in range(3):
      if dj == 0:
        hs = jnp.where(not_left, pltpu.roll(hb, 1, axis=1), 0.0)
      elif dj == 1:
        hs = hb
      else:
        hs = jnp.where(not_right, pltpu.roll(hb, L - 1, axis=1), 0.0)
      for di in range(3):
        if di == 0:
          tap = jnp.where(not_top, pltpu.roll(hs, W, axis=1), 0.0)
        elif di == 1:
          tap = hs
        else:
          tap = jnp.where(not_bot, pltpu.roll(hs, L - W, axis=1), 0.0)
        acc = acc + tap * wdw_ref[di * 3 + dj, sl]      # (band, 1) per-channel weight
    h2b = jnp.clip(acc, 0.0, 6.0)                       # (band, L)
    # ---- Stage 3 (partial): project this channel band, accumulate (Cout, L).
    # w3t is stored (Chid, Cout) so the band slice is an aligned sublane slice.
    return y + lax.dot_general(
        w3t_ref[sl], h2b.astype(jnp.bfloat16),
        (((0,), (0,)), ((), ())), preferred_element_type=jnp.float32)

  # Projection accumulator starts at the folded-BN bias.
  y0 = jnp.broadcast_to(b3_ref[...], (cout, L)).astype(jnp.float32)
  if nbands == 1:
    y = band_step(0, y0)
  else:
    y = lax.fori_loop(
        0, nbands,
        lambda i, acc_y: band_step(pl.multiple_of(i * band, band), acc_y), y0)

  if shortcut:
    y = y + x
  o_ref[0] = y.astype(o_ref.dtype)


def inverted_residual(x, params, *, stride, expand_ratio, grid_steps=None):
  """Fused InvertedResidual forward.  x: (B, Cin, H, W) float32 (NCHW, as in PyTorch)."""
  w1, b1, wdw9, b2, w3t, b3 = params
  B, Cin, H, W = x.shape
  Chid = wdw9.shape[1]
  Cout = w3t.shape[1]
  HW = H * W
  shortcut = (stride == 1) and (Cin == Cout)
  expand = expand_ratio != 1

  if grid_steps is None:
    grid_steps = _default_grid_steps(B)
  if B % grid_steps != 0:
    grid_steps = 1
  G = B // grid_steps                    # images merged into one step's lane axis
  L = G * HW

  # Channel-major, merged-image slab: x_m[s, c, g*HW + p] = x[s*G + g, c, p].
  # Layout plumbing stays outside the kernel (XLA).
  x_m = x.reshape(grid_steps, G, Cin, HW).transpose(0, 2, 1, 3).reshape(grid_steps, Cin, L)
  if expand and not shortcut:
    # x is only consumed as a bf16 MXU operand for these blocks: halve input DMA.
    x_m = x_m.astype(jnp.bfloat16)

  band = _pick_channel_band(Chid) if expand else Chid

  kernel = functools.partial(
      _inverted_residual_kernel,
      H=H, W=W, images=G, expand=expand, shortcut=shortcut, band=band)

  # Weight-invariant BlockSpecs (index_map always 0): fetched once, re-used per step.
  in_specs = [pl.BlockSpec((1, Cin, L), lambda s: (s, 0, 0))]
  args = [x_m]
  if expand:
    in_specs += [pl.BlockSpec((Chid, Cin), lambda s: (0, 0)),
                 pl.BlockSpec((Chid, 1), lambda s: (0, 0))]
    args += [w1, b1]
  in_specs += [pl.BlockSpec((9, Chid, 1), lambda s: (0, 0, 0)),
               pl.BlockSpec((Chid, 1), lambda s: (0, 0)),
               pl.BlockSpec((Chid, Cout), lambda s: (0, 0)),
               pl.BlockSpec((Cout, 1), lambda s: (0, 0))]
  args += [wdw9, b2, w3t, b3]

  flops = B * ((2 * HW * Cin * Chid if expand else 0)
               + 2 * 9 * HW * Chid
               + 2 * HW * Chid * Cout)
  bytes_accessed = int(
      x_m.size * x_m.dtype.itemsize
      + B * Cout * HW * 4
      + sum(int(a.size) * a.dtype.itemsize for a in args[1:]))

  out = pl.pallas_call(
      kernel,
      out_shape=jax.ShapeDtypeStruct((grid_steps, Cout, L), jnp.float32),
      grid_spec=pltpu.PrefetchScalarGridSpec(
          num_scalar_prefetch=0,
          grid=(grid_steps,),
          in_specs=in_specs,
          out_specs=pl.BlockSpec((1, Cout, L), lambda s: (s, 0, 0)),
      ),
      compiler_params=pltpu.CompilerParams(dimension_semantics=("parallel",)),
      cost_estimate=pl.CostEstimate(
          flops=int(flops), transcendentals=0, bytes_accessed=bytes_accessed),
  )(*args)

  y = out.reshape(grid_steps, Cout, G, HW).transpose(0, 2, 1, 3).reshape(B, Cout, H, W)
  if stride != 1:
    # Kernel stores the dense stride-1 map (lane-dense store); the 1x1 projection
    # commutes with spatial subsampling, so the strided pick is done here by XLA.
    y = y[:, :, ::stride, ::stride]
  return y


# --------------------- parameter construction (deterministic, BN folded) -----------
def make_params(key, in_channel, out_channel, expand_ratio, eps=1e-5):
  hidden = in_channel * expand_ratio
  ks = jax.random.split(key, 6)

  def bn(k, c):
    kg, kb, km, kv = jax.random.split(k, 4)
    gamma = 1.0 + 0.1 * jax.random.normal(kg, (c,), jnp.float32)
    beta = 0.1 * jax.random.normal(kb, (c,), jnp.float32)
    mean = 0.1 * jax.random.normal(km, (c,), jnp.float32)
    var = jnp.abs(jax.random.normal(kv, (c,), jnp.float32)) + 0.5
    scale = gamma / jnp.sqrt(var + eps)
    return scale, beta - mean * scale

  # 1x1 expand conv: torch weight (hidden, in, 1, 1) -> (hidden, in), bf16 for the MXU.
  w1_t = 0.1 * jax.random.normal(ks[0], (hidden, in_channel), jnp.float32)
  s1, b1 = bn(ks[1], hidden)
  w1 = (w1_t * s1[:, None]).astype(jnp.bfloat16)                    # (hidden, in)

  # depthwise 3x3: torch weight (hidden, 1, 3, 3) -> (9, hidden, 1), f32 (VPU math).
  wdw_t = 0.1 * jax.random.normal(ks[2], (hidden, 3, 3), jnp.float32)
  s2, b2 = bn(ks[3], hidden)
  wdw9 = jnp.transpose((wdw_t * s2[:, None, None]).reshape(hidden, 9))[:, :, None]

  # 1x1 project conv: torch weight (out, hidden, 1, 1) -> stored transposed
  # (hidden, out) so per-band slices are aligned sublane slices, bf16.
  w3_t = 0.1 * jax.random.normal(ks[4], (out_channel, hidden), jnp.float32)
  s3, b3 = bn(ks[5], out_channel)
  w3t = jnp.transpose(w3_t * s3[:, None]).astype(jnp.bfloat16)      # (hidden, out)

  return (w1, b1.reshape(hidden, 1), wdw9, b2.reshape(hidden, 1),
          w3t, b3.reshape(out_channel, 1))


# --------------------- pure-JAX reference (mirrors the bf16 matmul numerics) -------
def reference_forward(x, params, *, stride, expand_ratio):
  w1, b1, wdw9, b2, w3t, b3 = params
  B, Cin, H, W = x.shape
  Chid = wdw9.shape[1]
  Cout = w3t.shape[1]
  shortcut = (stride == 1) and (Cin == Cout)

  h = x
  if expand_ratio != 1:
    h = jnp.einsum('oc,bchw->bohw', w1, x.astype(jnp.bfloat16),
                   preferred_element_type=jnp.float32)
    h = jnp.clip(h + b1.reshape(1, Chid, 1, 1), 0.0, 6.0)

  wdw_hwio = wdw9[:, :, 0].reshape(3, 3, Chid)[:, :, None, :]       # (3, 3, 1, Chid)
  dw = lax.conv_general_dilated(
      h, wdw_hwio, window_strides=(stride, stride), padding=((1, 1), (1, 1)),
      dimension_numbers=('NCHW', 'HWIO', 'NCHW'), feature_group_count=Chid,
      precision=lax.Precision.HIGHEST)
  h2 = jnp.clip(dw + b2.reshape(1, Chid, 1, 1), 0.0, 6.0)

  y = jnp.einsum('co,bchw->bohw', w3t, h2.astype(jnp.bfloat16),
                 preferred_element_type=jnp.float32)
  y = y + b3.reshape(1, Cout, 1, 1)
  return x + y if shortcut else y


if __name__ == "__main__":
  root = jax.random.PRNGKey(0)

  # (in_channel, out_channel, stride, expand_ratio)
  configs = [
      (8, 8, 1, 4),     # expanded block with residual shortcut
      (16, 16, 1, 1),   # expand_ratio == 1: no expand conv, shortcut
      (8, 16, 1, 6),    # channel-changing block, no shortcut (bf16 input path)
      (16, 24, 2, 6),   # stride-2 block, Chid=96 -> two channel bands (fori_loop path)
  ]
  B, H, W = 2, 16, 16

  for idx, (cin, cout, stride, er) in enumerate(configs):
    kx, kp = jax.random.split(jax.random.fold_in(root, idx))
    x = jax.random.normal(kx, (B, cin, H, W), jnp.float32)
    params = make_params(kp, cin, cout, er)

    out = jax.block_until_ready(
        inverted_residual(x, params, stride=stride, expand_ratio=er))
    ref = reference_forward(x, params, stride=stride, expand_ratio=er)

    # Both 1x1 convs use bf16 MXU operands (mirrored in the reference); tolerance
    # covers rare 1-ulp bf16 rounding of the intermediate activation caused by
    # f32 accumulation-order differences.
    np.testing.assert_allclose(np.asarray(out), np.asarray(ref),
                               rtol=2e-2, atol=2e-2)

  print("KERNEL_OK")
</pallas_src>

<mosaic_0001>
module attributes {stable_mosaic.version = 11 : i64} {
  func.func @_inverted_residual_kernel(%arg0: i32, %arg1: memref<1x8x512xf32, #tpu.memory_space<vmem>>, %arg2: memref<32x8xbf16, #tpu.memory_space<vmem>>, %arg3: memref<32x1xf32, #tpu.memory_space<vmem>>, %arg4: memref<9x32x1xf32, #tpu.memory_space<vmem>>, %arg5: memref<32x1xf32, #tpu.memory_space<vmem>>, %arg6: memref<32x8xbf16, #tpu.memory_space<vmem>>, %arg7: memref<8x1xf32, #tpu.memory_space<vmem>>, %arg8: memref<1x8x512xf32, #tpu.memory_space<vmem>>) attributes {dimension_semantics = [#tpu.dimension_semantics<parallel>], iteration_bounds = array<i64: 1>, scalar_prefetch = 0 : i64, scratch_operands = 0 : i64, tpu.core_type = #tpu.core_type<tc>, window_params = [{transform_indices = @transform_0, window_bounds = array<i64: 1, 8, 512>}, {pipeline_mode = #tpu.pipeline_mode<synchronous>, transform_indices = @transform_1, window_bounds = array<i64: 32, 8>}, {pipeline_mode = #tpu.pipeline_mode<synchronous>, transform_indices = @transform_2, window_bounds = array<i64: 32, 1>}, {pipeline_mode = #tpu.pipeline_mode<synchronous>, transform_indices = @transform_3, window_bounds = array<i64: 9, 32, 1>}, {pipeline_mode = #tpu.pipeline_mode<synchronous>, transform_indices = @transform_4, window_bounds = array<i64: 32, 1>}, {pipeline_mode = #tpu.pipeline_mode<synchronous>, transform_indices = @transform_5, window_bounds = array<i64: 32, 8>}, {pipeline_mode = #tpu.pipeline_mode<synchronous>, transform_indices = @transform_6, window_bounds = array<i64: 8, 1>}, {transform_indices = @transform_7, window_bounds = array<i64: 1, 8, 512>}]} {
    %c0 = arith.constant 0 : index
    %c0_0 = arith.constant 0 : index
    %c0_1 = arith.constant 0 : index
    %0 = vector.load %arg1[%c0, %c0_0, %c0_1] : memref<1x8x512xf32, #tpu.memory_space<vmem>>, vector<1x8x512xf32>
    %1 = vector.shape_cast %0 : vector<1x8x512xf32> to vector<8x512xf32>
    %2 = tpu.iota {dimensions = array<i32: 1>} : vector<1x512xi32>
    %c256_i32 = arith.constant 256 : i32
    %c0_i32 = arith.constant 0 : i32
    %3 = arith.cmpi eq, %c256_i32, %c0_i32 : i32
    %c1_i32 = arith.constant 1 : i32
    %4 = arith.select %3, %c1_i32, %c256_i32 : i32
    %5 = vector.broadcast %4 : i32 to vector<1x512xi32>
    %6 = arith.remsi %2, %5 : vector<1x512xi32>
    %c0_i32_2 = arith.constant 0 : i32
    %7 = vector.broadcast %c0_i32_2 : i32 to vector<1x512xi32>
    %8 = arith.cmpi ne, %6, %7 : vector<1x512xi32>
    %c0_i32_3 = arith.constant 0 : i32
    %9 = vector.broadcast %c0_i32_3 : i32 to vector<1x512xi32>
    %10 = arith.cmpi slt, %6, %9 : vector<1x512xi32>
    %c0_i32_4 = arith.constant 0 : i32
    %11 = arith.cmpi slt, %4, %c0_i32_4 : i32
    %12 = vector.broadcast %11 : i1 to vector<1x512xi1>
    %13 = vector.broadcast %12 : vector<1x512xi1> to vector<1x512xi1>
    %14 = arith.xori %10, %13 : vector<1x512xi1>
    %15 = arith.andi %14, %8 : vector<1x512xi1>
    %16 = vector.broadcast %4 : i32 to vector<1x512xi32>
    %17 = arith.addi %6, %16 : vector<1x512xi32>
    %18 = arith.select %15, %17, %6 : vector<1x512xi1>, vector<1x512xi32>
    %c16_i32 = arith.constant 16 : i32
    %c0_i32_5 = arith.constant 0 : i32
    %19 = arith.cmpi eq, %c16_i32, %c0_i32_5 : i32
    %c1_i32_6 = arith.constant 1 : i32
    %20 = arith.select %19, %c1_i32_6, %c16_i32 : i32
    %21 = vector.broadcast %20 : i32 to vector<1x512xi32>
    %22 = arith.remsi %18, %21 : vector<1x512xi32>
    %c0_i32_7 = arith.constant 0 : i32
    %23 = vector.broadcast %c0_i32_7 : i32 to vector<1x512xi32>
    %24 = arith.cmpi ne, %22, %23 : vector<1x512xi32>
    %c0_i32_8 = arith.constant 0 : i32
    %25 = vector.broadcast %c0_i32_8 : i32 to vector<1x512xi32>
    %26 = arith.cmpi slt, %22, %25 : vector<1x512xi32>
    %c0_i32_9 = arith.constant 0 : i32
    %27 = arith.cmpi slt, %20, %c0_i32_9 : i32
    %28 = vector.broadcast %27 : i1 to vector<1x512xi1>
    %29 = vector.broadcast %28 : vector<1x512xi1> to vector<1x512xi1>
    %30 = arith.xori %26, %29 : vector<1x512xi1>
    %31 = arith.andi %30, %24 : vector<1x512xi1>
    %32 = vector.broadcast %20 : i32 to vector<1x512xi32>
    %33 = arith.addi %22, %32 : vector<1x512xi32>
    %34 = arith.select %31, %33, %22 : vector<1x512xi1>, vector<1x512xi32>
    %c0_i32_10 = arith.constant 0 : i32
    %35 = vector.broadcast %c0_i32_10 : i32 to vector<1x512xi32>
    %36 = arith.cmpi sgt, %34, %35 : vector<1x512xi32>
    %c15_i32 = arith.constant 15 : i32
    %37 = vector.broadcast %c15_i32 : i32 to vector<1x512xi32>
    %38 = arith.cmpi slt, %34, %37 : vector<1x512xi32>
    %c16_i32_11 = arith.constant 16 : i32
    %39 = vector.broadcast %c16_i32_11 : i32 to vector<1x512xi32>
    %40 = arith.cmpi sge, %18, %39 : vector<1x512xi32>
    %c240_i32 = arith.constant 240 : i32
    %41 = vector.broadcast %c240_i32 : i32 to vector<1x512xi32>
    %42 = arith.cmpi slt, %18, %41 : vector<1x512xi32>
    %43 = arith.truncf %1 : vector<8x512xf32> to vector<8x512xbf16>
    %c0_12 = arith.constant 0 : index
    %c0_13 = arith.constant 0 : index
    %44 = vector.load %arg7[%c0_12, %c0_13] : memref<8x1xf32, #tpu.memory_space<vmem>>, vector<8x1xf32>
    %45 = vector.shape_cast %44 : vector<8x1xf32> to vector<8x1xf32>
    %46 = vector.broadcast %45 : vector<8x1xf32> to vector<8x512xf32>
    %c0_14 = arith.constant 0 : index
    %c0_15 = arith.constant 0 : index
    %47 = vector.load %arg2[%c0_14, %c0_15] : memref<32x8xbf16, #tpu.memory_space<vmem>>, vector<32x8xbf16>
    %cst = arith.constant dense<0.000000e+00> : vector<32x512xf32>
    %48 = tpu.matmul %47, %43, %cst {dimension_numbers = #tpu.dot_dimension_numbers<[1], [0], [0], [1], [0, 0, 1, 1], [], []>} : vector<32x8xbf16>, vector<8x512xbf16>, vector<32x512xf32> -> vector<32x512xf32>
    %c0_16 = arith.constant 0 : index
    %c0_17 = arith.constant 0 : index
    %49 = vector.load %arg3[%c0_16, %c0_17] : memref<32x1xf32, #tpu.memory_space<vmem>>, vector<32x1xf32>
    %50 = vector.broadcast %49 : vector<32x1xf32> to vector<32x512xf32>
    %51 = arith.addf %48, %50 : vector<32x512xf32>
    %cst_18 = arith.constant 0.000000e+00 : f32
    %cst_19 = arith.constant 6.000000e+00 : f32
    %52 = vector.broadcast %cst_18 : f32 to vector<32x512xf32>
    %53 = arith.maximumf %52, %51 : vector<32x512xf32>
    %54 = vector.broadcast %cst_19 : f32 to vector<32x512xf32>
    %55 = arith.minimumf %54, %53 : vector<32x512xf32>
    %c0_20 = arith.constant 0 : index
    %c0_21 = arith.constant 0 : index
    %56 = vector.load %arg5[%c0_20, %c0_21] : memref<32x1xf32, #tpu.memory_space<vmem>>, vector<32x1xf32>
    %57 = vector.shape_cast %56 : vector<32x1xf32> to vector<32x1xf32>
    %58 = vector.broadcast %57 : vector<32x1xf32> to vector<32x512xf32>
    %c1_i32_22 = arith.constant 1 : i32
    %59 = tpu.dynamic_rotate %55 by %c1_i32_22 dim 1 : vector<32x512xf32>, i32 -> vector<32x512xf32>
    %cst_23 = arith.constant 0.000000e+00 : f32
    %60 = vector.shape_cast %36 : vector<1x512xi1> to vector<1x512xi1>
    %61 = vector.broadcast %60 : vector<1x512xi1> to vector<32x512xi1>
    %62 = vector.broadcast %cst_23 : f32 to vector<32x512xf32>
    %63 = arith.select %61, %59, %62 : vector<32x512xi1>, vector<32x512xf32>
    %c16_i32_24 = arith.constant 16 : i32
    %64 = tpu.dynamic_rotate %63 by %c16_i32_24 dim 1 : vector<32x512xf32>, i32 -> vector<32x512xf32>
    %cst_25 = arith.constant 0.000000e+00 : f32
    %65 = vector.shape_cast %40 : vector<1x512xi1> to vector<1x512xi1>
    %66 = vector.broadcast %65 : vector<1x512xi1> to vector<32x512xi1>
    %67 = vector.broadcast %cst_25 : f32 to vector<32x512xf32>
    %68 = arith.select %66, %64, %67 : vector<32x512xi1>, vector<32x512xf32>
    %c0_26 = arith.constant 0 : index
    %c0_27 = arith.constant 0 : index
    %c0_28 = arith.constant 0 : index
    %69 = vector.load %arg4[%c0_26, %c0_27, %c0_28] : memref<9x32x1xf32, #tpu.memory_space<vmem>>, vector<1x32x1xf32>
    %70 = vector.shape_cast %69 : vector<1x32x1xf32> to vector<32x1xf32>
    %71 = vector.broadcast %70 : vector<32x1xf32> to vector<32x512xf32>
    %72 = arith.mulf %68, %71 : vector<32x512xf32>
    %73 = arith.addf %58, %72 : vector<32x512xf32>
    %c3 = arith.constant 3 : index
    %c0_29 = arith.constant 0 : index
    %c0_30 = arith.constant 0 : index
    %74 = vector.load %arg4[%c3, %c0_29, %c0_30] : memref<9x32x1xf32, #tpu.memory_space<vmem>>, vector<1x32x1xf32>
    %75 = vector.shape_cast %74 : vector<1x32x1xf32> to vector<32x1xf32>
    %76 = vector.broadcast %75 : vector<32x1xf32> to vector<32x512xf32>
    %77 = arith.mulf %63, %76 : vector<32x512xf32>
    %78 = arith.addf %73, %77 : vector<32x512xf32>
    %c496_i32 = arith.constant 496 : i32
    %79 = tpu.dynamic_rotate %63 by %c496_i32 dim 1 : vector<32x512xf32>, i32 -> vector<32x512xf32>
    %cst_31 = arith.constant 0.000000e+00 : f32
    %80 = vector.shape_cast %42 : vector<1x512xi1> to vector<1x512xi1>
    %81 = vector.broadcast %80 : vector<1x512xi1> to vector<32x512xi1>
    %82 = vector.broadcast %cst_31 : f32 to vector<32x512xf32>
    %83 = arith.select %81, %79, %82 : vector<32x512xi1>, vector<32x512xf32>
    %c6 = arith.constant 6 : index
    %c0_32 = arith.constant 0 : index
    %c0_33 = arith.constant 0 : index
    %84 = vector.load %arg4[%c6, %c0_32, %c0_33] : memref<9x32x1xf32, #tpu.memory_space<vmem>>, vector<1x32x1xf32>
    %85 = vector.shape_cast %84 : vector<1x32x1xf32> to vector<32x1xf32>
    %86 = vector.broadcast %85 : vector<32x1xf32> to vector<32x512xf32>
    %87 = arith.mulf %83, %86 : vector<32x512xf32>
    %88 = arith.addf %78, %87 : vector<32x512xf32>
    %c16_i32_34 = arith.constant 16 : i32
    %89 = tpu.dynamic_rotate %55 by %c16_i32_34 dim 1 : vector<32x512xf32>, i32 -> vector<32x512xf32>
    %cst_35 = arith.constant 0.000000e+00 : f32
    %90 = vector.shape_cast %40 : vector<1x512xi1> to vector<1x512xi1>
    %91 = vector.broadcast %90 : vector<1x512xi1> to vector<32x512xi1>
    %92 = vector.broadcast %cst_35 : f32 to vector<32x512xf32>
    %93 = arith.select %91, %89, %92 : vector<32x512xi1>, vector<32x512xf32>
    %c1 = arith.constant 1 : index
    %c0_36 = arith.constant 0 : index
    %c0_37 = arith.constant 0 : index
    %94 = vector.load %arg4[%c1, %c0_36, %c0_37] : memref<9x32x1xf32, #tpu.memory_space<vmem>>, vector<1x32x1xf32>
    %95 = vector.shape_cast %94 : vector<1x32x1xf32> to vector<32x1xf32>
    %96 = vector.broadcast %95 : vector<32x1xf32> to vector<32x512xf32>
    %97 = arith.mulf %93, %96 : vector<32x512xf32>
    %98 = arith.addf %88, %97 : vector<32x512xf32>
    %c4 = arith.constant 4 : index
    %c0_38 = arith.constant 0 : index
    %c0_39 = arith.constant 0 : index
    %99 = vector.load %arg4[%c4, %c0_38, %c0_39] : memref<9x32x1xf32, #tpu.memory_space<vmem>>, vector<1x32x1xf32>
    %100 = vector.shape_cast %99 : vector<1x32x1xf32> to vector<32x1xf32>
    %101 = vector.broadcast %100 : vector<32x1xf32> to vector<32x512xf32>
    %102 = arith.mulf %55, %101 : vector<32x512xf32>
    %103 = arith.addf %98, %102 : vector<32x512xf32>
    %c496_i32_40 = arith.constant 496 : i32
    %104 = tpu.dynamic_rotate %55 by %c496_i32_40 dim 1 : vector<32x512xf32>, i32 -> vector<32x512xf32>
    %cst_41 = arith.constant 0.000000e+00 : f32
    %105 = vector.shape_cast %42 : vector<1x512xi1> to vector<1x512xi1>
    %106 = vector.broadcast %105 : vector<1x512xi1> to vector<32x512xi1>
    %107 = vector.broadcast %cst_41 : f32 to vector<32x512xf32>
    %108 = arith.select %106, %104, %107 : vector<32x512xi1>, vector<32x512xf32>
    %c7 = arith.constant 7 : index
    %c0_42 = arith.constant 0 : index
    %c0_43 = arith.constant 0 : index
    %109 = vector.load %arg4[%c7, %c0_42, %c0_43] : memref<9x32x1xf32, #tpu.memory_space<vmem>>, vector<1x32x1xf32>
    %110 = vector.shape_cast %109 : vector<1x32x1xf32> to vector<32x1xf32>
    %111 = vector.broadcast %110 : vector<32x1xf32> to vector<32x512xf32>
    %112 = arith.mulf %108, %111 : vector<32x512xf32>
    %113 = arith.addf %103, %112 : vector<32x512xf32>
    %c511_i32 = arith.constant 511 : i32
    %114 = tpu.dynamic_rotate %55 by %c511_i32 dim 1 : vector<32x512xf32>, i32 -> vector<32x512xf32>
    %cst_44 = arith.constant 0.000000e+00 : f32
    %115 = vector.shape_cast %38 : vector<1x512xi1> to vector<1x512xi1>
    %116 = vector.broadcast %115 : vector<1x512xi1> to vector<32x512xi1>
    %117 = vector.broadcast %cst_44 : f32 to vector<32x512xf32>
    %118 = arith.select %116, %114, %117 : vector<32x512xi1>, vector<32x512xf32>
    %c16_i32_45 = arith.constant 16 : i32
    %119 = tpu.dynamic_rotate %118 by %c16_i32_45 dim 1 : vector<32x512xf32>, i32 -> vector<32x512xf32>
    %cst_46 = arith.constant 0.000000e+00 : f32
    %120 = vector.shape_cast %40 : vector<1x512xi1> to vector<1x512xi1>
    %121 = vector.broadcast %120 : vector<1x512xi1> to vector<32x512xi1>
    %122 = vector.broadcast %cst_46 : f32 to vector<32x512xf32>
    %123 = arith.select %121, %119, %122 : vector<32x512xi1>, vector<32x512xf32>
    %c2 = arith.constant 2 : index
    %c0_47 = arith.constant 0 : index
    %c0_48 = arith.constant 0 : index
    %124 = vector.load %arg4[%c2, %c0_47, %c0_48] : memref<9x32x1xf32, #tpu.memory_space<vmem>>, vector<1x32x1xf32>
    %125 = vector.shape_cast %124 : vector<1x32x1xf32> to vector<32x1xf32>
    %126 = vector.broadcast %125 : vector<32x1xf32> to vector<32x512xf32>
    %127 = arith.mulf %123, %126 : vector<32x512xf32>
    %128 = arith.addf %113, %127 : vector<32x512xf32>
    %c5 = arith.constant 5 : index
    %c0_49 = arith.constant 0 : index
    %c0_50 = arith.constant 0 : index
    %129 = vector.load %arg4[%c5, %c0_49, %c0_50] : memref<9x32x1xf32, #tpu.memory_space<vmem>>, vector<1x32x1xf32>
    %130 = vector.shape_cast %129 : vector<1x32x1xf32> to vector<32x1xf32>
    %131 = vector.broadcast %130 : vector<32x1xf32> to vector<32x512xf32>
    %132 = arith.mulf %118, %131 : vector<32x512xf32>
    %133 = arith.addf %128, %132 : vector<32x512xf32>
    %c496_i32_51 = arith.constant 496 : i32
    %134 = tpu.dynamic_rotate %118 by %c496_i32_51 dim 1 : vector<32x512xf32>, i32 -> vector<32x512xf32>
    %cst_52 = arith.constant 0.000000e+00 : f32
    %135 = vector.shape_cast %42 : vector<1x512xi1> to vector<1x512xi1>
    %136 = vector.broadcast %135 : vector<1x512xi1> to vector<32x512xi1>
    %137 = vector.broadcast %cst_52 : f32 to vector<32x512xf32>
    %138 = arith.select %136, %134, %137 : vector<32x512xi1>, vector<32x512xf32>
    %c8 = arith.constant 8 : index
    %c0_53 = arith.constant 0 : index
    %c0_54 = arith.constant 0 : index
    %139 = vector.load %arg4[%c8, %c0_53, %c0_54] : memref<9x32x1xf32, #tpu.memory_space<vmem>>, vector<1x32x1xf32>
    %140 = vector.shape_cast %139 : vector<1x32x1xf32> to vector<32x1xf32>
    %141 = vector.broadcast %140 : vector<32x1xf32> to vector<32x512xf32>
    %142 = arith.mulf %138, %141 : vector<32x512xf32>
    %143 = arith.addf %133, %142 : vector<32x512xf32>
    %cst_55 = arith.constant 0.000000e+00 : f32
    %cst_56 = arith.constant 6.000000e+00 : f32
    %144 = vector.broadcast %cst_55 : f32 to vector<32x512xf32>
    %145 = arith.maximumf %144, %143 : vector<32x512xf32>
    %146 = vector.broadcast %cst_56 : f32 to vector<32x512xf32>
    %147 = arith.minimumf %146, %145 : vector<32x512xf32>
    %c0_57 = arith.constant 0 : index
    %c0_58 = arith.constant 0 : index
    %148 = vector.load %arg6[%c0_57, %c0_58] : memref<32x8xbf16, #tpu.memory_space<vmem>>, vector<32x8xbf16>
    %149 = arith.truncf %147 : vector<32x512xf32> to vector<32x512xbf16>
    %cst_59 = arith.constant dense<0.000000e+00> : vector<8x512xf32>
    %150 = tpu.matmul %148, %149, %cst_59 {dimension_numbers = #tpu.dot_dimension_numbers<[0], [0], [1], [1], [0, 1, 1, 1], [], []>} : vector<32x8xbf16>, vector<32x512xbf16>, vector<8x512xf32> -> vector<8x512xf32>
    %151 = arith.addf %46, %150 : vector<8x512xf32>
    %152 = arith.addf %151, %1 : vector<8x512xf32>
    %c0_60 = arith.constant 0 : index
    %c0_61 = arith.constant 0 : index
    %c0_62 = arith.constant 0 : index
    %153 = vector.load %arg8[%c0_60, %c0_61, %c0_62] : memref<1x8x512xf32, #tpu.memory_space<vmem>>, vector<1x8x512xf32>
    %154 = vector.shape_cast %153 : vector<1x8x512xf32> to vector<8x512xf32>
    %155 = vector.shape_cast %152 : vector<8x512xf32> to vector<1x8x512xf32>
    tpu.vector_store %arg8[%c0_60, %c0_61, %c0_62], %155 {strides = array<i32>} : memref<1x8x512xf32, #tpu.memory_space<vmem>>, vector<1x8x512xf32>,
    return
  }
  func.func @transform_0(%arg0: i32) -> (i32, i32, i32) {
    %c0_i32 = arith.constant 0 : i32
    %c0_i32_0 = arith.constant 0 : i32
    %c0_i32_1 = arith.constant 0 : i32
    return %arg0, %c0_i32, %c0_i32_0 : i32, i32, i32
  }
  func.func @transform_1(%arg0: i32) -> (i32, i32) {
    %c0_i32 = arith.constant 0 : i32
    %c0_i32_0 = arith.constant 0 : i32
    %c0_i32_1 = arith.constant 0 : i32
    return %c0_i32, %c0_i32_0 : i32, i32
  }
  func.func @transform_2(%arg0: i32) -> (i32, i32) {
    %c0_i32 = arith.constant 0 : i32
    %c0_i32_0 = arith.constant 0 : i32
    %c0_i32_1 = arith.constant 0 : i32
    return %c0_i32, %c0_i32_0 : i32, i32
  }
  func.func @transform_3(%arg0: i32) -> (i32, i32, i32) {
    %c0_i32 = arith.constant 0 : i32
    %c0_i32_0 = arith.constant 0 : i32
    %c0_i32_1 = arith.constant 0 : i32
    %c0_i32_2 = arith.constant 0 : i32
    return %c0_i32, %c0_i32_0, %c0_i32_1 : i32, i32, i32
  }
  func.func @transform_4(%arg0: i32) -> (i32, i32) {
    %c0_i32 = arith.constant 0 : i32
    %c0_i32_0 = arith.constant 0 : i32
    %c0_i32_1 = arith.constant 0 : i32
    return %c0_i32, %c0_i32_0 : i32, i32
  }
  func.func @transform_5(%arg0: i32) -> (i32, i32) {
    %c0_i32 = arith.constant 0 : i32
    %c0_i32_0 = arith.constant 0 : i32
    %c0_i32_1 = arith.constant 0 : i32
    return %c0_i32, %c0_i32_0 : i32, i32
  }
  func.func @transform_6(%arg0: i32) -> (i32, i32) {
    %c0_i32 = arith.constant 0 : i32
    %c0_i32_0 = arith.constant 0 : i32
    %c0_i32_1 = arith.constant 0 : i32
    return %c0_i32, %c0_i32_0 : i32, i32
  }
  func.func @transform_7(%arg0: i32) -> (i32, i32, i32) {
    %c0_i32 = arith.constant 0 : i32
    %c0_i32_0 = arith.constant 0 : i32
    %c0_i32_1 = arith.constant 0 : i32
    return %arg0, %c0_i32, %c0_i32_0 : i32, i32, i32
  }
}

</mosaic_0001>

<bundles_post_ra>
// kernel: tpu_custom_call.1
= control target key start
LH: loop header
LB: loop body
LE: loop exit
PB: predicated region body
PF: predicated region fallthrough
CT: control target
= control target key end

     0   :  { %vm204_vm0 = vcmask 1043456   ;;  %v1705_v3 = vmov 0   ;;  %vm197_vm1 = vcmask 64512   ;;  %s3391_s0 = inlined_call_operand.vmem [shape: f32[1,8,512], index: 0, kind: input, shape index: {}]   ;;  %s3392_s1 = inlined_call_operand.vmem [shape: bf16[32,8], index: 1, kind: input, shape index: {}]   ;;  %s3393_s2 = inlined_call_operand.vmem [shape: f32[32,1], index: 2, kind: input, shape index: {}]   ;;  %s3394_s3 = inlined_call_operand.vmem [shape: f32[9,32,1], index: 3, kind: input, shape index: {}]   ;;  %s3395_s4 = inlined_call_operand.vmem [shape: f32[32,1], index: 4, kind: input, shape index: {}]   ;;  %s3396_s5 = inlined_call_operand.vmem [shape: bf16[32,8], index: 5, kind: input, shape index: {}]   ;;  %s3397_s6 = inlined_call_operand.vmem [shape: f32[8,1], index: 6, kind: input, shape index: {}]   ;;  %s3398_s7 = inlined_call_operand.hbm [shape: f32[1,8,512], index: 7, kind: output, shape index: {}]  }
   0x1   :  { %v153_v0 = vld [vmem:[%s3397_s6] sm:$0xff]  ;;  %v29_v1 = vld [vmem:[%s3391_s0 + $0x8] sm:$0xff]  ;;  %v31_v2 = vld [vmem:[%s3391_s0 + $0x18] sm:$0xff]  ;;  %1673 = vset.pattern.permute.xlu0 %v1705_v3  ;;  %249 = vmatprep.mubr.bf16.mxu0 %v1705_v3 }
   0x2   :  { %v150_v4 = vpack.c.bf16 %v29_v1, %v29_v1  ;;  %v152_v5 = vpack.c.bf16 %v31_v2, %v31_v2  ;;  %v28_v6 = vld [vmem:[%s3391_s0] sm:$0xff]  ;;  %v30_v7 = vld [vmem:[%s3391_s0 + $0x10] sm:$0xff]  ;;  %156 = vperm.xlu0 %1673, %v153_v0   ;;  %302 = vmatprep.mubr.bf16.mxu1 %v1705_v3  ;;  %v164_v11 = vld [vmem:[%s3393_s2 + $0x8] sm:$0xff] }
   0x3   :  { %v149_v8 = vpack.c.bf16 %v28_v6, %v28_v6  ;;  %v151_v9 = vpack.c.bf16 %v30_v7, %v30_v7  ;;  %v163_v10 = vld [vmem:[%s3393_s2] sm:$0xff]  ;;  %1674 = vset.pattern.permute.xlu1 %v1705_v3  ;;  %v166_v15 = vld [vmem:[%s3393_s2 + $0x18] sm:$0xff]  ;;  %v165_v16 = vld [vmem:[%s3393_s2 + $0x10] sm:$0xff] }
   0x4   :  { %1625 = vmatprep.subr.msk.bf16.mxu0 %vm204_vm0, %v150_v4  ;;  %1628 = vmatprep.subr.msk.bf16.mxu1 %vm204_vm0, %v152_v5  ;;  %v1675_v14 = vld [vmem:[%s3392_s1] sm:$0xff]   ;;  %v356_v17 = vld [vmem:[%s3395_s4 + $0x8] sm:$0xff]  ;;  %v358_v20 = vld [vmem:[%s3395_s4 + $0x18] sm:$0xff] }
   0x5   :  { %v206_v12 = vsel %vm204_vm0, %v149_v8, 0  ;;  %v212_v13 = vsel %vm204_vm0, %v151_v9, 0  ;;  %174 = vperm.xlu1 %1674, %v164_v11   ;;  %v355_v18 = vld [vmem:[%s3395_s4] sm:$0xff]  ;;  %v1676_v19 = vld [vmem:[%s3392_s1 + $0x8] sm:$0xff]   ;;  %v357_v21 = vld [vmem:[%s3395_s4 + $0x10] sm:$0xff] }
   0x6   :  { %232 = vmatpush1.bf16.msra.mxu0 %v206_v12  ;;  %285 = vmatpush1.bf16.msra.mxu1 %v212_v13  ;;  %v526_v22 = vld [vmem:[%s3394_s3 + $0x8] sm:$0xff]  ;;  %v525_v23 = vld [vmem:[%s3394_s3] sm:$0xff] }
   0x7   :  { %169 = vperm.xlu0 %1673, %v163_v10  }
   0x9   :  { %1626 = vmatmul.mubr.msk.bf16.vlgmr.msra.gmra.mxu0 %vm197_vm1, %v1675_v14  ;;  %1629 = vmatmul.mubr.msk.bf16.vlgmr.msra.gmra.mxu1 %vm197_vm1, %v1675_v14 }
   0xa   :  { %259 = vmatprep.mubr.bf16.mxu0 %v1705_v3  ;;  %312 = vmatprep.mubr.bf16.mxu1 %v1705_v3 }
   0xb   :  { %184 = vperm.xlu0 %1673, %v166_v15   ;;  %179 = vperm.xlu1 %1674, %v165_v16  }
   0xf   :  { %366 = vperm.xlu0 %1673, %v356_v17   ;;  %361 = vperm.xlu1 %1674, %v355_v18  }
  0x11   :  { %1627 = vmatmul.mubr.msk.bf16.gmra.mxu0 %vm197_vm1, %v1676_v19  ;;  %1630 = vmatmul.mubr.msk.bf16.gmra.mxu1 %vm197_vm1, %v1676_v19 }
  0x12   :  { %1547 = vmatprep.mubr.bf16.mxu0 %v1705_v3  ;;  %1588 = vmatprep.mubr.bf16.mxu1 %v1705_v3 }
  0x13   :  { %376 = vperm.xlu0 %1673, %v358_v20   ;;  %371 = vperm.xlu1 %1674, %v357_v21  }
  0x14   :  { %12 = vsyncpa [#allocation3], 0  ;;  %v528_v24 = vld [vmem:[%s3394_s3 + $0x18] sm:$0xff]  ;;  %v527_v25 = vld [vmem:[%s3394_s3 + $0x10] sm:$0xff]  ;;  %s1707_s21 = smov 1   ;;  %s1708_s22 = smov 16  }
  0x15   :  { %v1632_v26 = vld [vmem:[%s3394_s3 + $0x68] sm:$0xff]  ;;  %v1631_v27 = vld [vmem:[%s3394_s3 + $0x60] sm:$0xff]  ;;  %v1634_v28 = vld [vmem:[%s3394_s3 + $0x78] sm:$0xff]  ;;  %s1709_s23 = smov 112   ;;  %s1710_s30 = smov [#allocation2]  }
  0x16   :  { %v1633_v29 = vld [vmem:[%s3394_s3 + $0x70] sm:$0xff]  ;;  %v1638_v30 = vld [vmem:[%s3394_s3 + $0xd8] sm:$0xff]  ;;  %v1636_v34 = vld [vmem:[%s3394_s3 + $0xc8] sm:$0xff]  ;;  %s1615_s1 = sshll.u32 %s1710_s30, 4  ;;  %s1616_s1 = int_to_ptr.vmem [resolvable:$true] %s1615_s1 }
  0x17   :  { %536 = vperm.xlu0 %1673, %v526_v22   ;;  %531 = vperm.xlu1 %1674, %v525_v23   ;;  %v1637_v31 = vld [vmem:[%s3394_s3 + $0xd0] sm:$0xff]  ;;  %v1642_v32 = vld [vmem:[%s3394_s3 + $0x38] sm:$0xff]  ;;  %v1635_v35 = vld [vmem:[%s3394_s3 + $0xc0] sm:$0xff]  ;;  %s1683_s6 = scalar_lea.vmem %s1616_s1, 512  ;;  %p1688_p1 = scmp.lt.s32.totalorder %s1616_s1, %s1616_s1 }
  0x18   :  { %v1641_v33 = vld [vmem:[%s3394_s3 + $0x30] sm:$0xff]  ;;  %v1646_v36 = vld [vmem:[%s3394_s3 + $0x98] sm:$0xff]  ;;  %v1640_v38 = vld [vmem:[%s3394_s3 + $0x28] sm:$0xff]  ;;  %p1684_p0 = scmp.ne.s32.totalorder %s1616_s1, %s1683_s6  ;;  %p1689_p2 = scmp.lt.s32.totalorder %s1683_s6, %s1683_s6 }
  0x19   :  { %v1645_v37 = vld [vmem:[%s3394_s3 + $0x90] sm:$0xff]  ;;  %v1639_v39 = vld [vmem:[%s3394_s3 + $0x20] sm:$0xff]  ;;  %v1650_v40 = vld [vmem:[%s3394_s3 + $0xf8] sm:$0xff] }
  0x1a   :  { %v1649_v41 = vld [vmem:[%s3394_s3 + $0xf0] sm:$0xff]  ;;  %v1644_v42 = vld [vmem:[%s3394_s3 + $0x88] sm:$0xff]  ;;  %v1643_v43 = vld [vmem:[%s3394_s3 + $0x80] sm:$0xff]  ;;  %p1690_p3 = por %p1689_p2, %p1688_p1 }
  0x1b   :  { %546 = vperm.xlu0 %1673, %v528_v24   ;;  %541 = vperm.xlu1 %1674, %v527_v25   ;;  %v1654_v44 = vld [vmem:[%s3394_s3 + $0x58] sm:$0xff]  ;;  %v1653_v45 = vld [vmem:[%s3394_s3 + $0x50] sm:$0xff]  ;;  %v1648_v46 = vld [vmem:[%s3394_s3 + $0xe8] sm:$0xff] }
  0x1c   :  { %v1647_v47 = vld [vmem:[%s3394_s3 + $0xe0] sm:$0xff]  ;;  %v1658_v48 = vld [vmem:[%s3394_s3 + $0xb8] sm:$0xff]  ;;  %v1657_v49 = vld [vmem:[%s3394_s3 + $0xb0] sm:$0xff]  ;;  %p1691_p4 = pnand %p1690_p3, %p1684_p0 }
  0x1d   :  { %v1652_v50 = vld [vmem:[%s3394_s3 + $0x48] sm:$0xff]  ;;  %v1651_v51 = vld [vmem:[%s3394_s3 + $0x40] sm:$0xff]  ;;  %v1662_v52 = vld [vmem:[%s3394_s3 + $0x118] sm:$0xff] }
  0x1e   :  { %v1661_v53 = vld [vmem:[%s3394_s3 + $0x110] sm:$0xff]  ;;  %v1656_v54 = vld [vmem:[%s3394_s3 + $0xa8] sm:$0xff]  ;;  %v1655_v55 = vld [vmem:[%s3394_s3 + $0xa0] sm:$0xff] }
  0x1f   :  { %593 = vperm.xlu0 %1673, %v1632_v26   ;;  %588 = vperm.xlu1 %1674, %v1631_v27   ;;  %v1660_v56 = vld [vmem:[%s3394_s3 + $0x108] sm:$0xff]  ;;  %v1659_v57 = vld [vmem:[%s3394_s3 + $0x100] sm:$0xff]  ;;  %s1706_s3 = smov 127  }
  0x23   :  { %603 = vperm.xlu0 %1673, %v1634_v28   ;;  %598 = vperm.xlu1 %1674, %v1633_v29  }
  0x27   :  { %733 = vperm.xlu0 %1673, %v1638_v30   ;;  %728 = vperm.xlu1 %1674, %v1637_v31  }
  0x2b   :  { %854 = vperm.xlu0 %1673, %v1642_v32   ;;  %849 = vperm.xlu1 %1674, %v1641_v33  }
  0x2f   :  { %723 = vperm.xlu0 %1673, %v1636_v34   ;;  %718 = vperm.xlu1 %1674, %v1635_v35  }
  0x33   :  { %911 = vperm.xlu0 %1673, %v1646_v36   ;;  %906 = vperm.xlu1 %1674, %v1645_v37  }
  0x37   :  { %844 = vperm.xlu0 %1673, %v1640_v38   ;;  %839 = vperm.xlu1 %1674, %v1639_v39  }
  0x3b   :  { %1032 = vperm.xlu0 %1673, %v1650_v40   ;;  %1027 = vperm.xlu1 %1674, %v1649_v41  }
  0x3f   :  { %901 = vperm.xlu0 %1673, %v1644_v42   ;;  %896 = vperm.xlu1 %1674, %v1643_v43  }
  0x43   :  { %1226 = vperm.xlu0 %1673, %v1654_v44   ;;  %1221 = vperm.xlu1 %1674, %v1653_v45  }
  0x47   :  { %1022 = vperm.xlu0 %1673, %v1648_v46   ;;  %1017 = vperm.xlu1 %1674, %v1647_v47  }
  0x4b   :  { %1283 = vperm.xlu0 %1673, %v1658_v48   ;;  %1278 = vperm.xlu1 %1674, %v1657_v49  }
  0x4f   :  { %1216 = vperm.xlu0 %1673, %v1652_v50   ;;  %1211 = vperm.xlu1 %1674, %v1651_v51  }
  0x53   :  { %1404 = vperm.xlu0 %1673, %v1662_v52   ;;  %1399 = vperm.xlu1 %1674, %v1661_v53  }
  0x57   :  { %1273 = vperm.xlu0 %1673, %v1656_v54   ;;  %1268 = vperm.xlu1 %1674, %v1655_v55  }
  0x5b   :  { %1394 = vperm.xlu0 %1673, %v1660_v56   ;;  %1389 = vperm.xlu1 %1674, %v1659_v57  }
  0x7d   :  { %v1912_v58 = vpop.permute.xlu0 %156 }
  0x7e   :  { %3478 = vst [vmem:[#allocation5_spill] sm:$0xff] %v1912_v58 }
  0x80   :  { %v1914_v60 = vpop.permute.xlu1 %174 }
  0x82   :  { %v170_v59 = vpop.permute.xlu0 %169 }
  0x86   :  { %v1916_v61 = vpop.permute.xlu0 %184  ;;  %v1918_v62 = vpop.permute.xlu1 %179 }
  0x8a   :  { %v1920_v4 = vpop.permute.xlu0 %366  ;;  %v1922_v5 = vpop.permute.xlu1 %361 }
  0x8e   :  { %v1930_v11 = vpop.permute.xlu0 %376  ;;  %v1932_v12 = vpop.permute.xlu1 %371 }
  0x8f   :  { %3479 = vst [vmem:[#allocation6_spill] sm:$0xff] %v1930_v11  ;;  %3480 = vst [vmem:[#allocation7_spill] sm:$0xff] %v1932_v12 }
  0x92   :  { %v1943_v21 = vpop.permute.xlu0 %536  ;;  %v1945_v22 = vpop.permute.xlu1 %531 }
  0x96   :  { %v1958_v26 = vpop.permute.xlu0 %546  ;;  %v1960_v27 = vpop.permute.xlu1 %541 }
  0x97   :  { %3483 = vst [vmem:[#allocation10_spill] sm:$0xff] %v1958_v26  ;;  %3484 = vst [vmem:[#allocation11_spill] sm:$0xff] %v1960_v27 }
  0x9a   :  { %v1970_v31 = vpop.permute.xlu0 %593  ;;  %v1972_v32 = vpop.permute.xlu1 %588 }
  0x9e   :  { %v1982_v33 = vpop.permute.xlu0 %603  ;;  %v1984_v34 = vpop.permute.xlu1 %598 }
  0x9f   :  { %3487 = vst [vmem:[#allocation14_spill] sm:$0xff] %v1982_v33  ;;  %3488 = vst [vmem:[#allocation15_spill] sm:$0xff] %v1984_v34 }
  0xa2   :  { %v1991_v38 = vpop.permute.xlu0 %733  ;;  %v1993_v39 = vpop.permute.xlu1 %728 }
  0xa3   :  { %3489 = vst [vmem:[#allocation16_spill] sm:$0xff] %v1991_v38  ;;  %3490 = vst [vmem:[#allocation17_spill] sm:$0xff] %v1993_v39 }
  0xa6   :  { %v2004_v42 = vpop.permute.xlu0 %854  ;;  %v2006_v43 = vpop.permute.xlu1 %849 }
  0xa7   :  { %3491 = vst [vmem:[#allocation18_spill] sm:$0xff] %v2004_v42  ;;  %3492 = vst [vmem:[#allocation19_spill] sm:$0xff] %v2006_v43 }
  0xaa   :  { %v2016_v47 = vpop.permute.xlu0 %723  ;;  %v2018_v48 = vpop.permute.xlu1 %718 }
  0xab   :  { %3495 = vst [vmem:[#allocation22_spill] sm:$0xff] %v2016_v47 }
  0xae   :  { %v2028_v49 = vpop.permute.xlu0 %911  ;;  %v2030_v50 = vpop.permute.xlu1 %906 }
  0xaf   :  { %3496 = vst [vmem:[#allocation23_spill] sm:$0xff] %v2028_v49  ;;  %3497 = vst [vmem:[#allocation24_spill] sm:$0xff] %v2030_v50 }
  0xb2   :  { %v2037_v53 = vpop.permute.xlu0 %844  ;;  %v2039_v54 = vpop.permute.xlu1 %839 }
  0xb3   :  { %3498 = vst [vmem:[#allocation25_spill] sm:$0xff] %v2037_v53 }
  0xc9   :  { %v251_v63 = vpop.f32.mrf.mxu0  ;;  %v304_v0 = vpop.f32.mrf.mxu1 }
  0xca   :  { %v252_v1 = vadd.f32 %v251_v63, %v170_v59  ;;  %v305_v2 = vadd.f32 %v304_v0, %v170_v59  ;;  %v2052_v63 = vpop.permute.xlu1 %1027 }
  0xcb   :  { %v253_v3 = vpop.f32.mrf.mxu0  ;;  %v306_v10 = vpop.f32.mrf.mxu1  ;;  %3500 = vst [vmem:[#allocation27_spill] sm:$0xff] %v2052_v63 }
  0xcc   :  { %v323_v6 = vmax.f32 %v252_v1, 0.0  ;;  %v325_v8 = vmax.f32 %v305_v2, 0.0  ;;  %v254_v9 = vadd.f32 %v253_v3, %v170_v59  ;;  %v307_v15 = vadd.f32 %v306_v10, %v170_v59 }
  0xcd   :  { %v255_v16 = vpop.f32.mrf.mxu0  ;;  %v308_v20 = vpop.f32.mrf.mxu1 }
  0xce   :  { %v1924_v7 = vmin.f32 %v323_v6, 6.0  ;;  %v1934_v13 = vmin.f32 %v325_v8, 6.0  ;;  %v324_v14 = vmax.f32 %v254_v9, 0.0  ;;  %v326_v18 = vmax.f32 %v307_v15, 0.0  ;;  %v2066_v15 = vpop.permute.xlu1 %896 }
  0xcf   :  { %v256_v19 = vadd.f32 %v255_v16, %v1914_v60  ;;  %v309_v25 = vadd.f32 %v308_v20, %v1914_v60  ;;  %v257_v35 = vpop.f32.mrf.mxu0  ;;  %v310_v37 = vpop.f32.mrf.mxu1 }
  0xd0   :  { %1067 = vrot.lane.b32.xlu0 %v1924_v7, %s1706_s3  ;;  %379 = vrot.lane.b32.xlu1 %v1924_v7, %s1707_s21  ;;  %3481 = vst [vmem:[#allocation8_spill] sm:$0xff] %v1934_v13  ;;  %v1940_v17 = vmin.f32 %v324_v14, 6.0  ;;  %v1951_v23 = vmin.f32 %v326_v18, 6.0  ;;  %v258_v36 = vadd.f32 %v257_v35, %v1914_v60  ;;  %v311_v41 = vadd.f32 %v310_v37, %v1914_v60  ;;  %v2050_v60 = vpop.permute.xlu0 %1032 }
  0xd1   :  { %v327_v24 = vmax.f32 %v256_v19, 0.0  ;;  %v329_v29 = vmax.f32 %v309_v25, 0.0  ;;  %v261_v51 = vpop.f32.mrf.mxu0  ;;  %v314_v55 = vpop.f32.mrf.mxu1  ;;  %3499 = vst [vmem:[#allocation26_spill] sm:$0xff] %v2050_v60 }
  0xd2   :  { %3482 = vst [vmem:[#allocation9_spill] sm:$0xff] %v1951_v23  ;;  %v328_v40 = vmax.f32 %v258_v36, 0.0  ;;  %v330_v45 = vmax.f32 %v311_v41, 0.0  ;;  %v262_v52 = vadd.f32 %v261_v51, %v1918_v62  ;;  %v315_v57 = vadd.f32 %v314_v55, %v1918_v62 }
  0xd3   :  { %v1962_v28 = vmin.f32 %v327_v24, 6.0  ;;  %v1968_v30 = vmin.f32 %v329_v29, 6.0  ;;  %v263_v59 = vpop.f32.mrf.mxu0  ;;  %v316_v3 = vpop.f32.mrf.mxu1 }
  0xd4   :  { %1083 = vrot.lane.b32.xlu0 %v1934_v13, %s1706_s3  ;;  %395 = vrot.lane.b32.xlu1 %v1934_v13, %s1707_s21  ;;  %v2008_v44 = vmin.f32 %v328_v40, 6.0  ;;  %v2014_v46 = vmin.f32 %v330_v45, 6.0  ;;  %v331_v56 = vmax.f32 %v262_v52, 0.0  ;;  %v333_v1 = vmax.f32 %v315_v57, 0.0  ;;  %v2064_v14 = vpop.permute.xlu0 %901  ;;  %v2081_v24 = vpop.permute.xlu1 %1221 }
  0xd5   :  { %3485 = vst [vmem:[#allocation12_spill] sm:$0xff] %v1962_v28  ;;  %3486 = vst [vmem:[#allocation13_spill] sm:$0xff] %v1968_v30  ;;  %v264_v2 = vadd.f32 %v263_v59, %v1918_v62  ;;  %v317_v9 = vadd.f32 %v316_v3, %v1918_v62  ;;  %v265_v10 = vpop.f32.mrf.mxu0  ;;  %v318_v20 = vpop.f32.mrf.mxu1 }
  0xd6   :  { %3493 = vst [vmem:[#allocation20_spill] sm:$0xff] %v2008_v44  ;;  %3494 = vst [vmem:[#allocation21_spill] sm:$0xff] %v2014_v46  ;;  %v2054_v0 = vmin.f32 %v331_v56, 6.0  ;;  %v2061_v6 = vmin.f32 %v333_v1, 6.0  ;;  %v266_v19 = vadd.f32 %v265_v10, %v1916_v61  ;;  %v319_v35 = vadd.f32 %v318_v20, %v1916_v61 }
  0xd7   :  { %v332_v8 = vmax.f32 %v264_v2, 0.0  ;;  %3503 = vst [vmem:[#allocation30_spill] sm:$0xff] %v2064_v14  ;;  %v334_v18 = vmax.f32 %v317_v9, 0.0  ;;  %3506 = vst [vmem:[#allocation33_spill] sm:$0xff] %v2081_v24  ;;  %v267_v55 = vpop.f32.mrf.mxu0  ;;  %v320_v1 = vpop.f32.mrf.mxu1 }
  0xd8   :  { %1075 = vrot.lane.b32.xlu0 %v1940_v17, %s1706_s3  ;;  %768 = vrot.lane.b32.xlu1 %v1924_v7, %s1708_s22  ;;  %3501 = vst [vmem:[#allocation28_spill] sm:$0xff] %v2054_v0  ;;  %3502 = vst [vmem:[#allocation29_spill] sm:$0xff] %v2061_v6  ;;  %v2079_v62 = vpop.permute.xlu0 %1226  ;;  %v335_v29 = vmax.f32 %v266_v19, 0.0  ;;  %v337_v37 = vmax.f32 %v319_v35, 0.0  ;;  %v2094_v41 = vpop.permute.xlu1 %1017  ;;  %v268_v59 = vadd.f32 %v267_v55, %v1916_v61 }
  0xd9   :  { %v2072_v16 = vmin.f32 %v332_v8, 6.0  ;;  %3505 = vst [vmem:[#allocation32_spill] sm:$0xff] %v2079_v62  ;;  %v2083_v25 = vmin.f32 %v334_v18, 6.0  ;;  %v321_v9 = vadd.f32 %v320_v1, %v1916_v61 }
  0xda   :  { %v2090_v36 = vmin.f32 %v335_v29, 6.0  ;;  %v2100_v45 = vmin.f32 %v337_v37, 6.0  ;;  %v336_v8 = vmax.f32 %v268_v59, 0.0 }
  0xdb   :  { %3504 = vst [vmem:[#allocation31_spill] sm:$0xff] %v2072_v16  ;;  %3507 = vst [vmem:[#allocation34_spill] sm:$0xff] %v2083_v25  ;;  %v338_v18 = vmax.f32 %v321_v9, 0.0 }
  0xdc   :  { %1091 = vrot.lane.b32.xlu0 %v1951_v23, %s1706_s3  ;;  %784 = vrot.lane.b32.xlu1 %v1934_v13, %s1708_s22  ;;  %3508 = vst [vmem:[#allocation35_spill] sm:$0xff] %v2090_v36  ;;  %v2092_v40 = vpop.permute.xlu0 %1022  ;;  %3510 = vst [vmem:[#allocation37_spill] sm:$0xff] %v2100_v45  ;;  %v2108_v52 = vpop.permute.xlu1 %1278  ;;  %v2136_v10 = vmin.f32 %v336_v8, 6.0 }
  0xdd   :  { %3509 = vst [vmem:[#allocation36_spill] sm:$0xff] %v2092_v40  ;;  %3512 = vst [vmem:[#allocation39_spill] sm:$0xff] %v2108_v52  ;;  %v2146_v61 = vmin.f32 %v338_v18, 6.0 }
  0xde   :  { %3517 = vst [vmem:[#allocation44_spill] sm:$0xff] %v2136_v10 }
  0xdf   :  { %3520 = vst [vmem:[#allocation47_spill] sm:$0xff] %v2146_v61 }
  0xe0   :  { %381 = vrot.lane.b32.xlu0 %v1962_v28, %s1707_s21  ;;  %946 = vrot.lane.b32.xlu1 %v1924_v7, %s1709_s23  ;;  %v2106_v51 = vpop.permute.xlu0 %1283  ;;  %v2116_v57 = vpop.permute.xlu1 %1211 }
  0xe1   :  { %3511 = vst [vmem:[#allocation38_spill] sm:$0xff] %v2106_v51  ;;  %3514 = vst [vmem:[#allocation41_spill] sm:$0xff] %v2116_v57 }
  0xe4   :  { %397 = vrot.lane.b32.xlu0 %v1968_v30, %s1707_s21  ;;  %962 = vrot.lane.b32.xlu1 %v1934_v13, %s1709_s23  ;;  %v2114_v56 = vpop.permute.xlu0 %1216  ;;  %v2129_v3 = vpop.permute.xlu1 %1399 }
  0xe5   :  { %3513 = vst [vmem:[#allocation40_spill] sm:$0xff] %v2114_v56  ;;  %3516 = vst [vmem:[#allocation43_spill] sm:$0xff] %v2129_v3 }
  0xe8   :  { %770 = vrot.lane.b32.xlu0 %v1962_v28, %s1708_s22  ;;  %387 = vrot.lane.b32.xlu1 %v1940_v17, %s1707_s21  ;;  %v2127_v2 = vpop.permute.xlu0 %1404  ;;  %v2140_v20 = vpop.permute.xlu1 %1268 }
  0xe9   :  { %3515 = vst [vmem:[#allocation42_spill] sm:$0xff] %v2127_v2  ;;  %3519 = vst [vmem:[#allocation46_spill] sm:$0xff] %v2140_v20  ;;  %v32_v2 = vlaneseq }
  0xeb   :  { %v2186_v62 = vand.u32 127, %v32_v2 }
  0xec   :  { %786 = vrot.lane.b32.xlu0 %v1968_v30, %s1708_s22  ;;  %403 = vrot.lane.b32.xlu1 %v1951_v23, %s1707_s21  ;;  %v2138_v19 = vpop.permute.xlu0 %1273  ;;  %v2154_v35 = vpop.permute.xlu1 %1389 }
  0xed   :  { %3518 = vst [vmem:[#allocation45_spill] sm:$0xff] %v2138_v19  ;;  %3522 = vst [vmem:[#allocation49_spill] sm:$0xff] %v2154_v35  ;;  %v41_v60 = vand.u32 255, %v2186_v62  ;;  %v35_v42 = vadd.s32 256, %v2186_v62  ;;  %vm411_vm3 = vcmp.lt.s32.totalorder %v2186_v62, 1  ;;  %vm484_vm4 = vcmp.lt.s32.totalorder %v2186_v62, 16 }
  0xee   :  { %vm670_vm9 = vcmp.lt.s32.totalorder %v2186_v62, 112  ;;  %vm1099_vm13 = vcmp.lt.s32.totalorder %v2186_v62, 127 }
  0xef   :  { %vm2243_vm7 = vcmp.ge.s32.totalorder %v41_v60, 16 }
  0xf0   :  { %948 = vrot.lane.b32.xlu0 %v1962_v28, %s1709_s23  ;;  %776 = vrot.lane.b32.xlu1 %v1940_v17, %s1708_s22  ;;  %v2152_v29 = vpop.permute.xlu0 %1394 }
  0xf1   :  { %3521 = vst [vmem:[#allocation48_spill] sm:$0xff] %v2152_v29 }
  0xf4   :  { %964 = vrot.lane.b32.xlu0 %v1968_v30, %s1709_s23  ;;  %792 = vrot.lane.b32.xlu1 %v1951_v23, %s1708_s22 }
  0xf8   :  { %389 = vrot.lane.b32.xlu0 %v2008_v44, %s1707_s21  ;;  %954 = vrot.lane.b32.xlu1 %v1940_v17, %s1709_s23 }
  0xfc   :  { %405 = vrot.lane.b32.xlu0 %v2014_v46, %s1707_s21  ;;  %970 = vrot.lane.b32.xlu1 %v1951_v23, %s1709_s23 }
 0x100   :  { %778 = vrot.lane.b32.xlu0 %v2008_v44, %s1708_s22  ;;  %1069 = vrot.lane.b32.xlu1 %v1962_v28, %s1706_s3 }
 0x104   :  { %794 = vrot.lane.b32.xlu0 %v2014_v46, %s1708_s22  ;;  %1085 = vrot.lane.b32.xlu1 %v1968_v30, %s1706_s3 }
 0x108   :  { %956 = vrot.lane.b32.xlu0 %v2008_v44, %s1709_s23  ;;  %1077 = vrot.lane.b32.xlu1 %v2008_v44, %s1706_s3 }
 0x10c   :  { %972 = vrot.lane.b32.xlu0 %v2014_v46, %s1709_s23  ;;  %1093 = vrot.lane.b32.xlu1 %v2014_v46, %s1706_s3 }
 0x110   :  { %1071 = vrot.lane.b32.xlu0 %v2054_v0, %s1706_s3  ;;  %383 = vrot.lane.b32.xlu1 %v2054_v0, %s1707_s21 }
 0x114   :  { %1087 = vrot.lane.b32.xlu0 %v2061_v6, %s1706_s3  ;;  %399 = vrot.lane.b32.xlu1 %v2061_v6, %s1707_s21 }
 0x118   :  { %1079 = vrot.lane.b32.xlu0 %v2072_v16, %s1706_s3  ;;  %772 = vrot.lane.b32.xlu1 %v2054_v0, %s1708_s22 }
 0x11c   :  { %1095 = vrot.lane.b32.xlu0 %v2083_v25, %s1706_s3  ;;  %788 = vrot.lane.b32.xlu1 %v2061_v6, %s1708_s22 }
 0x120   :  { %385 = vrot.lane.b32.xlu0 %v2090_v36, %s1707_s21  ;;  %950 = vrot.lane.b32.xlu1 %v2054_v0, %s1709_s23 }
 0x124   :  { %401 = vrot.lane.b32.xlu0 %v2100_v45, %s1707_s21  ;;  %966 = vrot.lane.b32.xlu1 %v2061_v6, %s1709_s23  ;;  %v55_v6 = vand.u32 255, %v35_v42 }
 0x126   :  { %vm2217_vm5 = vcmp.ge.s32.totalorder %v55_v6, 16 }
 0x128   :  { %774 = vrot.lane.b32.xlu0 %v2090_v36, %s1708_s22  ;;  %391 = vrot.lane.b32.xlu1 %v2072_v16, %s1707_s21 }
 0x12c   :  { %790 = vrot.lane.b32.xlu0 %v2100_v45, %s1708_s22  ;;  %407 = vrot.lane.b32.xlu1 %v2083_v25, %s1707_s21 }
 0x130   :  { %952 = vrot.lane.b32.xlu0 %v2090_v36, %s1709_s23  ;;  %780 = vrot.lane.b32.xlu1 %v2072_v16, %s1708_s22 }
 0x134   :  { %968 = vrot.lane.b32.xlu0 %v2100_v45, %s1709_s23  ;;  %796 = vrot.lane.b32.xlu1 %v2083_v25, %s1708_s22 }
 0x138   :  { %393 = vrot.lane.b32.xlu0 %v2136_v10, %s1707_s21  ;;  %958 = vrot.lane.b32.xlu1 %v2072_v16, %s1709_s23  ;;  %v36_v16 = vadd.s32 384, %v2186_v62 }
 0x13a   :  { %v62_v50 = vand.u32 255, %v36_v16 }
 0x13c   :  { %409 = vrot.lane.b32.xlu0 %v2146_v61, %s1707_s21  ;;  %974 = vrot.lane.b32.xlu1 %v2083_v25, %s1709_s23  ;;  %v2258_v0 = vand.u32 15, %v62_v50  ;;  %vm2292_vm12 = vcmp.lt.s32.totalorder %v62_v50, 240 }
 0x13e   :  { %vm136_vm11 = vcmp.gt.s32.totalorder %v2258_v0, 0  ;;  %vm140_vm1 = vcmp.lt.s32.totalorder %v2258_v0, 15 }
 0x140   :  { %782 = vrot.lane.b32.xlu0 %v2136_v10, %s1708_s22  ;;  %1073 = vrot.lane.b32.xlu1 %v2090_v36, %s1706_s3  ;;  %v2196_v36 = vand.u32 15, %v41_v60 }
 0x142   :  { %v2160_v37 = vpop.permute.xlu0 %1067  ;;  %v380_v55 = vpop.permute.xlu1 %379  ;;  %vm133_vm2 = vcmp.gt.s32.totalorder %v2196_v36, 0  ;;  %vm137_vm14 = vcmp.lt.s32.totalorder %v2196_v36, 15 }
 0x144   :  { %798 = vrot.lane.b32.xlu0 %v2146_v61, %s1708_s22  ;;  %1089 = vrot.lane.b32.xlu1 %v2100_v45, %s1706_s3 }
 0x146   :  { %v2166_v59 = vpop.permute.xlu0 %1083  ;;  %v396_v1 = vpop.permute.xlu1 %395 }
 0x148   :  { %960 = vrot.lane.b32.xlu0 %v2136_v10, %s1709_s23  ;;  %1081 = vrot.lane.b32.xlu1 %v2136_v10, %s1706_s3  ;;  %v34_v10 = vadd.s32 128, %v2186_v62 }
 0x14a   :  { %v2172_v8 = vpop.permute.xlu0 %1075  ;;  %v2174_v9 = vpop.permute.xlu1 %768  ;;  %v48_v24 = vand.u32 255, %v34_v10 }
 0x14c   :  { %976 = vrot.lane.b32.xlu0 %v2146_v61, %s1709_s23  ;;  %1097 = vrot.lane.b32.xlu1 %v2146_v61, %s1706_s3  ;;  %v2205_v63 = vand.u32 15, %v48_v24  ;;  %vm2270_vm10 = vcmp.lt.s32.totalorder %v48_v24, 240 }
 0x14e   :  { %v2180_v18 = vpop.permute.xlu0 %1091  ;;  %v2182_v58 = vpop.permute.xlu1 %784  ;;  %vm134_vm6 = vcmp.gt.s32.totalorder %v2205_v63, 0  ;;  %vm138_vm15 = vcmp.lt.s32.totalorder %v2205_v63, 15 }
 0x152   :  { %v382_v51 = vpop.permute.xlu0 %381  ;;  %v2184_v3 = vpop.permute.xlu1 %946 }
 0x156   :  { %v2188_v52 = vpop.permute.xlu0 %397  ;;  %v2190_v45 = vpop.permute.xlu1 %962 }
 0x157   :  { %3523 = vst [vmem:[#allocation50_spill] sm:$0xff] %v2190_v45 }
 0x15a   :  { %v2194_v49 = vpop.permute.xlu0 %770  ;;  %v388_v61 = vpop.permute.xlu1 %387 }
 0x15b   :  { %3524 = vst [vmem:[#allocation51_spill] sm:$0xff] %v2194_v49  ;;  %v420_v11 = vsel %vm411_vm3, %v380_v55, %v388_v61  ;;  %v416_v26 = vsel %vm411_vm3, %v388_v61, %v396_v1 }
 0x15c   :  { %v2239_v39 = vsel %vm134_vm6, %v420_v11, 0.0 }
 0x15e   :  { %v2201_v2 = vpop.permute.xlu0 %786  ;;  %v404_v38 = vpop.permute.xlu1 %403 }
 0x15f   :  { %3525 = vst [vmem:[#allocation52_spill] sm:$0xff] %v2201_v2  ;;  %v424_v25 = vsel %vm411_vm3, %v404_v38, %v380_v55  ;;  %v2232_v55 = vand.u32 15, %v55_v6  ;;  %v412_v34 = vsel %vm411_vm3, %v396_v1, %v404_v38 }
 0x160   :  { %v2211_v10 = vsel %vm133_vm2, %v424_v25, 0.0  ;;  %v2290_v24 = vsel %vm136_vm11, %v412_v34, 0.0 }
 0x161   :  { %452 = vrot.lane.b32.xlu1 %v2211_v10, %s1708_s22  ;;  %vm135_vm8 = vcmp.gt.s32.totalorder %v2232_v55, 0  ;;  %vm139_vm0 = vcmp.lt.s32.totalorder %v2232_v55, 15 }
 0x162   :  { %v2222_v42 = vpop.permute.xlu0 %948  ;;  %v2224_v43 = vpop.permute.xlu1 %776  ;;  %v2266_v61 = vsel %vm135_vm8, %v416_v26, 0.0 }
 0x163   :  { %3528 = vst [vmem:[#allocation53_spill] sm:$0xff] %v2222_v42  ;;  %v2230_v25 = vsel %vm484_vm4, %v2224_v43, %v2182_v58  ;;  %v608_v0 = vmul.f32 %v1972_v32, %v2266_v61 }
 0x165   :  { %460 = vrot.lane.b32.xlu1 %v2239_v39, %s1708_s22 }
 0x166   :  { %v965_v6 = vpop.permute.xlu0 %964  ;;  %v2250_v16 = vpop.permute.xlu1 %792 }
 0x167   :  { %v2256_v11 = vsel %vm484_vm4, %v2250_v16, %v2174_v9 }
 0x169   :  { %468 = vrot.lane.b32.xlu1 %v2266_v61, %s1708_s22 }
 0x16a   :  { %v390_v29 = vpop.permute.xlu0 %389  ;;  %v2277_v19 = vpop.permute.xlu1 %954 }
 0x16b   :  { %v2283_v26 = vsel %vm670_vm9, %v2277_v19, %v2190_v45  ;;  %v421_v20 = vsel %vm411_vm3, %v382_v51, %v390_v29  ;;  %v417_v40 = vsel %vm411_vm3, %v390_v29, %v2188_v52 }
 0x16c   :  { %v2358_v29 = vsel %vm135_vm8, %v417_v40, 0.0 }
 0x16d   :  { %476 = vrot.lane.b32.xlu1 %v2290_v24, %s1708_s22 }
 0x16e   :  { %v406_v60 = vpop.permute.xlu0 %405  ;;  %v2298_v35 = vpop.permute.xlu1 %970 }
 0x16f   :  { %3535 = vst [vmem:[#allocation54_spill] sm:$0xff] %v2298_v35  ;;  %v425_v56 = vsel %vm411_vm3, %v406_v60, %v382_v51  ;;  %v2306_v38 = vsel %vm670_vm9, %v2298_v35, %v2184_v3 }
 0x170   :  { %3536 = vst [vmem:[#allocation55_spill] sm:$0xff] %v2306_v38  ;;  %v2313_v50 = vsel %vm133_vm2, %v425_v56, 0.0  ;;  %v2336_v56 = vsel %vm134_vm6, %v421_v20, 0.0  ;;  %v1108_v20 = vsel %vm1099_vm13, %v2160_v37, %v2172_v8 }
 0x171   :  { %3537 = vst [vmem:[#allocation56_spill] sm:$0xff] %v2313_v50  ;;  %454 = vrot.lane.b32.xlu0 %v2313_v50, %s1708_s22  ;;  %638 = vrot.lane.b32.xlu1 %v2211_v10, %s1709_s23  ;;  %v2405_v53 = vsel %vm137_vm14, %v1108_v20, 0.0 }
 0x172   :  { %v2321_v46 = vpop.permute.xlu0 %778  ;;  %v2323_v30 = vpop.permute.xlu1 %1069  ;;  %3547 = vst [vmem:[#allocation66_spill] sm:$0xff] %v2405_v53 }
 0x173   :  { %3538 = vst [vmem:[#allocation57_spill] sm:$0xff] %v2321_v46  ;;  %v2329_v34 = vsel %vm484_vm4, %v2321_v46, %v2201_v2 }
 0x174   :  { %3539 = vst [vmem:[#allocation58_spill] sm:$0xff] %v2329_v34  ;;  %v413_v34 = vsel %vm411_vm3, %v2188_v52, %v406_v60 }
 0x175   :  { %462 = vrot.lane.b32.xlu0 %v2336_v56, %s1708_s22  ;;  %646 = vrot.lane.b32.xlu1 %v2239_v39, %s1709_s23  ;;  %v2380_v60 = vsel %vm136_vm11, %v413_v34, 0.0 }
 0x176   :  { %v2345_v2 = vpop.permute.xlu0 %794  ;;  %v1086_v44 = vpop.permute.xlu1 %1085  ;;  %3544 = vst [vmem:[#allocation63_spill] sm:$0xff] %v2380_v60 }
 0x177   :  { %3540 = vst [vmem:[#allocation59_spill] sm:$0xff] %v2345_v2  ;;  %v2351_v51 = vsel %vm484_vm4, %v2345_v2, %v2194_v49 }
 0x178   :  { %3541 = vst [vmem:[#allocation60_spill] sm:$0xff] %v2351_v51  ;;  %v1104_v51 = vsel %vm1099_vm13, %v2172_v8, %v2166_v59  ;;  %v1100_v8 = vsel %vm1099_vm13, %v2166_v59, %v2180_v18  ;;  %v1112_v59 = vsel %vm1099_vm13, %v2180_v18, %v2160_v37 }
 0x179   :  { %470 = vrot.lane.b32.xlu0 %v2358_v29, %s1708_s22  ;;  %654 = vrot.lane.b32.xlu1 %v2266_v61, %s1709_s23  ;;  %v2420_v20 = vsel %vm138_vm15, %v1104_v51, 0.0  ;;  %v2435_v51 = vsel %vm139_vm0, %v1100_v8, 0.0  ;;  %v2450_v8 = vsel %vm140_vm1, %v1112_v59, 0.0 }
 0x17a   :  { %v2368_v2 = vpop.permute.xlu0 %956  ;;  %v1078_v14 = vpop.permute.xlu1 %1077  ;;  %3548 = vst [vmem:[#allocation67_spill] sm:$0xff] %v2420_v20  ;;  %3549 = vst [vmem:[#allocation68_spill] sm:$0xff] %v2435_v51 }
 0x17b   :  { %3542 = vst [vmem:[#allocation61_spill] sm:$0xff] %v2368_v2  ;;  %v2373_v40 = vsel %vm670_vm9, %v2368_v2, %v965_v6  ;;  %v1109_v49 = vsel %vm1099_vm13, %v2323_v30, %v1078_v14  ;;  %v1105_v59 = vsel %vm1099_vm13, %v1078_v14, %v1086_v44 }
 0x17c   :  { %3543 = vst [vmem:[#allocation62_spill] sm:$0xff] %v2373_v40  ;;  %v2463_v46 = vsel %vm137_vm14, %v1109_v49, 0.0  ;;  %v2473_v38 = vsel %vm138_vm15, %v1105_v59, 0.0 }
 0x17d   :  { %478 = vrot.lane.b32.xlu0 %v2380_v60, %s1708_s22  ;;  %662 = vrot.lane.b32.xlu1 %v2290_v24, %s1709_s23  ;;  %3550 = vst [vmem:[#allocation69_spill] sm:$0xff] %v2463_v46 }
 0x17e   :  { %v973_v28 = vpop.permute.xlu0 %972  ;;  %v1094_v2 = vpop.permute.xlu1 %1093 }
 0x17f   :  { %v2393_v52 = vsel %vm670_vm9, %v965_v6, %v973_v28  ;;  %v2398_v34 = vsel %vm670_vm9, %v973_v28, %v2222_v42  ;;  %v1101_v23 = vsel %vm1099_vm13, %v1086_v44, %v1094_v2  ;;  %v1113_v59 = vsel %vm1099_vm13, %v1094_v2, %v2323_v30 }
 0x180   :  { %3545 = vst [vmem:[#allocation64_spill] sm:$0xff] %v2393_v52  ;;  %3546 = vst [vmem:[#allocation65_spill] sm:$0xff] %v2398_v34 }
 0x181   :  { %640 = vrot.lane.b32.xlu0 %v2313_v50, %s1709_s23  ;;  %1140 = vrot.lane.b32.xlu1 %v2405_v53, %s1708_s22 }
 0x182   :  { %v2416_v28 = vpop.permute.xlu0 %1071  ;;  %v384_v6 = vpop.permute.xlu1 %383 }
 0x185   :  { %648 = vrot.lane.b32.xlu0 %v2336_v56, %s1709_s23  ;;  %1148 = vrot.lane.b32.xlu1 %v2420_v20, %s1708_s22 }
 0x186   :  { %v2431_v40 = vpop.permute.xlu0 %1087  ;;  %v400_v34 = vpop.permute.xlu1 %399 }
 0x189   :  { %656 = vrot.lane.b32.xlu0 %v2358_v29, %s1709_s23  ;;  %1156 = vrot.lane.b32.xlu1 %v2435_v51, %s1708_s22 }
 0x18a   :  { %v2446_v52 = vpop.permute.xlu0 %1079  ;;  %v773_v42 = vpop.permute.xlu1 %772 }
 0x18d   :  { %664 = vrot.lane.b32.xlu0 %v2380_v60, %s1709_s23  ;;  %1164 = vrot.lane.b32.xlu1 %v2450_v8, %s1708_s22 }
 0x18e   :  { %v2459_v37 = vpop.permute.xlu0 %1095  ;;  %v789_v18 = vpop.permute.xlu1 %788 }
 0x191   :  { %1318 = vrot.lane.b32.xlu1 %v2405_v53, %s1709_s23  ;;  %1142 = vrot.lane.b32.xlu0 %v2463_v46, %s1708_s22  ;;  %v2485_v53 = vsel %vm139_vm0, %v1101_v23, 0.0 }
 0x192   :  { %v386_v57 = vpop.permute.xlu0 %385  ;;  %v951_v47 = vpop.permute.xlu1 %950  ;;  %3551 = vst [vmem:[#allocation70_spill] sm:$0xff] %v2485_v53 }
 0x195   :  { %1326 = vrot.lane.b32.xlu1 %v2420_v20, %s1709_s23  ;;  %1150 = vrot.lane.b32.xlu0 %v2473_v38, %s1708_s22  ;;  %v2494_v20 = vsel %vm140_vm1, %v1113_v59, 0.0 }
 0x196   :  { %v2481_v49 = vpop.permute.xlu0 %401  ;;  %v967_v14 = vpop.permute.xlu1 %966  ;;  %3552 = vst [vmem:[#allocation71_spill] sm:$0xff] %v2494_v20 }
 0x199   :  { %1158 = vrot.lane.b32.xlu0 %v2485_v53, %s1708_s22 }
 0x19a   :  { %v775_v44 = vpop.permute.xlu0 %774  ;;  %v392_v13 = vpop.permute.xlu1 %391 }
 0x19b   :  { %v422_v2 = vsel %vm411_vm3, %v384_v6, %v392_v13 }
 0x19d   :  { %1166 = vrot.lane.b32.xlu0 %v2494_v20, %s1708_s22 }
 0x19e   :  { %v791_v45 = vpop.permute.xlu0 %790  ;;  %v408_v35 = vpop.permute.xlu1 %407 }
 0x19f   :  { %v426_v23 = vsel %vm411_vm3, %v408_v35, %v384_v6 }
 0x1a0   :  { %v2502_v30 = vsel %vm133_vm2, %v426_v23, 0.0  ;;  %v2520_v23 = vsel %vm134_vm6, %v422_v2, 0.0 }
 0x1a1   :  { %1320 = vrot.lane.b32.xlu0 %v2463_v46, %s1709_s23  ;;  %456 = vrot.lane.b32.xlu1 %v2502_v30, %s1708_s22  ;;  %v418_v46 = vsel %vm411_vm3, %v392_v13, %v400_v34 }
 0x1a2   :  { %v953_v59 = vpop.permute.xlu0 %952  ;;  %v781_v20 = vpop.permute.xlu1 %780  ;;  %v2541_v6 = vsel %vm135_vm8, %v418_v46, 0.0 }
 0x1a3   :  { %v2512_v50 = vsel %vm484_vm4, %v781_v20, %v789_v18  ;;  %v2516_v53 = vsel %vm484_vm4, %v773_v42, %v781_v20 }
 0x1a4   :  { %3553 = vst [vmem:[#allocation72_spill] sm:$0xff] %v2512_v50  ;;  %3554 = vst [vmem:[#allocation73_spill] sm:$0xff] %v2516_v53  ;;  %v414_v50 = vsel %vm411_vm3, %v400_v34, %v408_v35 }
 0x1a5   :  { %1328 = vrot.lane.b32.xlu0 %v2473_v38, %s1709_s23  ;;  %464 = vrot.lane.b32.xlu1 %v2520_v23, %s1708_s22 }
 0x1a6   :  { %v969_v60 = vpop.permute.xlu0 %968  ;;  %v797_v20 = vpop.permute.xlu1 %796 }
 0x1a7   :  { %v2533_v53 = vsel %vm484_vm4, %v789_v18, %v797_v20  ;;  %v2537_v2 = vsel %vm484_vm4, %v797_v20, %v773_v42  ;;  %v2560_v20 = vsel %vm136_vm11, %v414_v50, 0.0 }
 0x1a8   :  { %3555 = vst [vmem:[#allocation74_spill] sm:$0xff] %v2533_v53  ;;  %3556 = vst [vmem:[#allocation75_spill] sm:$0xff] %v2537_v2 }
 0x1a9   :  { %472 = vrot.lane.b32.xlu1 %v2541_v6, %s1708_s22 }
 0x1aa   :  { %v394_v18 = vpop.permute.xlu0 %393  ;;  %v959_v53 = vpop.permute.xlu1 %958 }
 0x1ab   :  { %v2552_v42 = vsel %vm670_vm9, %v959_v53, %v967_v14  ;;  %v2556_v46 = vsel %vm670_vm9, %v951_v47, %v959_v53  ;;  %v419_v35 = vsel %vm411_vm3, %v394_v18, %v2481_v49 }
 0x1ac   :  { %3557 = vst [vmem:[#allocation76_spill] sm:$0xff] %v2552_v42  ;;  %3558 = vst [vmem:[#allocation77_spill] sm:$0xff] %v2556_v46  ;;  %v423_v42 = vsel %vm411_vm3, %v386_v57, %v394_v18 }
 0x1ad   :  { %480 = vrot.lane.b32.xlu1 %v2560_v20, %s1708_s22 }
 0x1ae   :  { %v410_v34 = vpop.permute.xlu0 %409  ;;  %v975_v13 = vpop.permute.xlu1 %974 }
 0x1af   :  { %v427_v2 = vsel %vm411_vm3, %v410_v34, %v386_v57  ;;  %v2571_v53 = vsel %vm670_vm9, %v967_v14, %v975_v13  ;;  %v2575_v50 = vsel %vm670_vm9, %v975_v13, %v951_v47  ;;  %v2600_v13 = vsel %vm134_vm6, %v423_v42, 0.0 }
 0x1b0   :  { %v2579_v46 = vsel %vm133_vm2, %v427_v2, 0.0  ;;  %v2622_v57 = vsel %vm135_vm8, %v419_v35, 0.0  ;;  %vm1511_vm2 = vcmask 261120  }
 0x1b1   :  { %458 = vrot.lane.b32.xlu0 %v2579_v46, %s1708_s22  ;;  %642 = vrot.lane.b32.xlu1 %v2502_v30, %s1709_s23 }
 0x1b2   :  { %v783_v14 = vpop.permute.xlu0 %782  ;;  %v1074_v18 = vpop.permute.xlu1 %1073 }
 0x1b3   :  { %v2592_v47 = vsel %vm484_vm4, %v783_v14, %v791_v45  ;;  %v2596_v2 = vsel %vm484_vm4, %v775_v44, %v783_v14 }
 0x1b4   :  { %3559 = vst [vmem:[#allocation78_spill] sm:$0xff] %v2592_v47  ;;  %3560 = vst [vmem:[#allocation79_spill] sm:$0xff] %v2596_v2  ;;  %v415_v47 = vsel %vm411_vm3, %v2481_v49, %v410_v34  ;;  %v1110_v34 = vsel %vm1099_vm13, %v2416_v28, %v2446_v52 }
 0x1b5   :  { %466 = vrot.lane.b32.xlu0 %v2600_v13, %s1708_s22  ;;  %650 = vrot.lane.b32.xlu1 %v2520_v23, %s1709_s23 }
 0x1b6   :  { %v799_v14 = vpop.permute.xlu0 %798 }
 0x1b7   :  { %v2614_v2 = vsel %vm484_vm4, %v791_v45, %v799_v14  ;;  %v2618_v42 = vsel %vm484_vm4, %v799_v14, %v775_v44  ;;  %v2644_v14 = vsel %vm136_vm11, %v415_v47, 0.0 }
 0x1b8   :  { %3561 = vst [vmem:[#allocation80_spill] sm:$0xff] %v2614_v2 }
 0x1b9   :  { %474 = vrot.lane.b32.xlu0 %v2622_v57, %s1708_s22  ;;  %658 = vrot.lane.b32.xlu1 %v2541_v6, %s1709_s23 }
 0x1ba   :  { %v961_v45 = vpop.permute.xlu0 %960 }
 0x1bb   :  { %v2636_v44 = vsel %vm670_vm9, %v961_v45, %v969_v60  ;;  %v2640_v35 = vsel %vm670_vm9, %v953_v59, %v961_v45 }
 0x1bc   :  { %3562 = vst [vmem:[#allocation81_spill] sm:$0xff] %v2636_v44  ;;  %3563 = vst [vmem:[#allocation82_spill] sm:$0xff] %v2640_v35  ;;  %v2667_v44 = vsel %vm137_vm14, %v1110_v34, 0.0  ;;  %v1106_v35 = vsel %vm1099_vm13, %v2446_v52, %v2431_v40  ;;  %v1102_v34 = vsel %vm1099_vm13, %v2431_v40, %v2459_v37 }
 0x1bd   :  { %482 = vrot.lane.b32.xlu0 %v2644_v14, %s1708_s22  ;;  %666 = vrot.lane.b32.xlu1 %v2560_v20, %s1709_s23  ;;  %v2694_v52 = vsel %vm139_vm0, %v1102_v34, 0.0 }
 0x1be   :  { %v977_v45 = vpop.permute.xlu0 %976 }
 0x1bf   :  { %v2659_v47 = vsel %vm670_vm9, %v969_v60, %v977_v45  ;;  %v2663_v49 = vsel %vm670_vm9, %v977_v45, %v953_v59  ;;  %v1090_v60 = vpop.permute.xlu1 %1089  ;;  %v2682_v59 = vsel %vm138_vm15, %v1106_v35, 0.0  ;;  %v1114_v35 = vsel %vm1099_vm13, %v2459_v37, %v2416_v28 }
 0x1c0   :  { %3564 = vst [vmem:[#allocation83_spill] sm:$0xff] %v2659_v47  ;;  %3565 = vst [vmem:[#allocation84_spill] sm:$0xff] %v2663_v49  ;;  %v2706_v40 = vsel %vm140_vm1, %v1114_v35, 0.0 }
 0x1c1   :  { %644 = vrot.lane.b32.xlu0 %v2579_v46, %s1709_s23  ;;  %1144 = vrot.lane.b32.xlu1 %v2667_v44, %s1708_s22  ;;  %3566 = vst [vmem:[#allocation85_spill] sm:$0xff] %v2682_v59 }
 0x1c3   :  { %v1082_v45 = vpop.permute.xlu1 %1081 }
 0x1c4   :  { %v1111_v34 = vsel %vm1099_vm13, %v1074_v18, %v1082_v45  ;;  %v1107_v2 = vsel %vm1099_vm13, %v1082_v45, %v1090_v60 }
 0x1c5   :  { %652 = vrot.lane.b32.xlu0 %v2600_v13, %s1709_s23  ;;  %1152 = vrot.lane.b32.xlu1 %v2682_v59, %s1708_s22  ;;  %v2716_v37 = vsel %vm137_vm14, %v1111_v34, 0.0  ;;  %v2726_v49 = vsel %vm138_vm15, %v1107_v2, 0.0 }
 0x1c7   :  { %v1098_v28 = vpop.permute.xlu1 %1097 }
 0x1c8   :  { %v1103_v47 = vsel %vm1099_vm13, %v1090_v60, %v1098_v28  ;;  %v1115_v63 = vsel %vm1099_vm13, %v1098_v28, %v1074_v18  ;;  %v607_v60 = vmul.f32 %v1972_v32, %v2239_v39 }
 0x1c9   :  { %660 = vrot.lane.b32.xlu0 %v2622_v57, %s1709_s23  ;;  %1160 = vrot.lane.b32.xlu1 %v2694_v52, %s1708_s22  ;;  %v2736_v45 = vsel %vm139_vm0, %v1103_v47, 0.0 }
 0x1cd   :  { %668 = vrot.lane.b32.xlu0 %v2644_v14, %s1709_s23  ;;  %1168 = vrot.lane.b32.xlu1 %v2706_v40, %s1708_s22 }
 0x1d1   :  { %1322 = vrot.lane.b32.xlu1 %v2667_v44, %s1709_s23  ;;  %1146 = vrot.lane.b32.xlu0 %v2716_v37, %s1708_s22 }
 0x1d3   :  { %v453_v35 = vpop.permute.xlu1 %452 }
 0x1d5   :  { %1330 = vrot.lane.b32.xlu1 %v2682_v59, %s1709_s23  ;;  %1154 = vrot.lane.b32.xlu0 %v2726_v49, %s1708_s22  ;;  %v2752_v59 = vsel %vm140_vm1, %v1115_v63, 0.0 }
 0x1d7   :  { %v461_v36 = vpop.permute.xlu1 %460 }
 0x1d8   :  { %v493_v34 = vsel %vm484_vm4, %v453_v35, %v461_v36 }
 0x1d9   :  { %v550_v2 = vmul.f32 %v1945_v22, %v493_v34  ;;  %1338 = vrot.lane.b32.xlu1 %v2694_v52, %s1709_s23  ;;  %1162 = vrot.lane.b32.xlu0 %v2736_v45, %s1708_s22 }
 0x1db   :  { %v566_v55 = vadd.f32 %v550_v2, %v1922_v5  ;;  %v469_v47 = vpop.permute.xlu1 %468 }
 0x1dc   :  { %v489_v18 = vsel %vm484_vm4, %v461_v36, %v469_v47 }
 0x1dd   :  { %v2756_v28 = vadd.f32 %v607_v60, %v566_v55  ;;  %v511_v34 = vsel %vm2217_vm5, %v489_v18, 0.0  ;;  %1346 = vrot.lane.b32.xlu1 %v2706_v40, %s1709_s23  ;;  %1170 = vrot.lane.b32.xlu0 %v2752_v59, %s1708_s22 }
 0x1de   :  { %v551_v39 = vmul.f32 %v1945_v22, %v511_v34 }
 0x1df   :  { %v477_v2 = vpop.permute.xlu1 %476 }
 0x1e0   :  { %v567_v63 = vadd.f32 %v551_v39, %v1922_v5  ;;  %v485_v36 = vsel %vm484_vm4, %v469_v47, %v477_v2  ;;  %v497_v60 = vsel %vm484_vm4, %v477_v2, %v453_v35  ;;  %v609_v47 = vmul.f32 %v1972_v32, %v2290_v24 }
 0x1e1   :  { %v509_v55 = vsel %vm2243_vm7, %v497_v60, 0.0  ;;  %v552_v18 = vmul.f32 %v1945_v22, %v485_v36  ;;  %1334 = vrot.lane.b32.xlu1 %v2435_v51, %s1709_s23  ;;  %1324 = vrot.lane.b32.xlu0 %v2716_v37, %s1709_s23  ;;  %v606_v36 = vmul.f32 %v1972_v32, %v2211_v10 }
 0x1e2   :  { %v549_v61 = vmul.f32 %v1945_v22, %v509_v55  ;;  %v2780_v34 = vadd.f32 %v608_v0, %v567_v63 }
 0x1e3   :  { %v568_v35 = vadd.f32 %v552_v18, %v1922_v5  ;;  %v455_v39 = vpop.permute.xlu0 %454  ;;  %v639_v2 = vpop.permute.xlu1 %638  ;;  %v3567_v18 = vsel %vm2243_vm7, %v2256_v11, 0.0 }
 0x1e4   :  { %v565_v60 = vadd.f32 %v549_v61, %v1922_v5  ;;  %v808_v5 = vsel %vm484_vm4, %v2174_v9, %v2224_v43  ;;  %v857_v61 = vmul.f32 %v2039_v54, %v3567_v18  ;;  %v986_v43 = vsel %vm670_vm9, %v2184_v3, %v2277_v19 }
 0x1e5   :  { %v2788_v51 = vadd.f32 %v609_v47, %v568_v35  ;;  %1342 = vrot.lane.b32.xlu1 %v2450_v8, %s1709_s23  ;;  %1332 = vrot.lane.b32.xlu0 %v2726_v49, %s1709_s23  ;;  %v914_v47 = vmul.f32 %v2066_v15, %v1924_v7  ;;  %v915_v35 = vmul.f32 %v2066_v15, %v1940_v17  ;;  %v3568_v7 = vsel %vm2217_vm5, %v2230_v25, 0.0 }
 0x1e6   :  { %v622_v22 = vadd.f32 %v606_v36, %v565_v60  ;;  %v611_v9 = vmul.f32 %v1970_v31, %v2336_v56  ;;  %v859_v17 = vmul.f32 %v2039_v54, %v3568_v7  ;;  %v800_v25 = vsel %vm484_vm4, %v2182_v58, %v2250_v16 }
 0x1e7   :  { %v463_v0 = vpop.permute.xlu0 %462  ;;  %v647_v24 = vpop.permute.xlu1 %646 }
 0x1e8   :  { %v494_v63 = vsel %vm484_vm4, %v455_v39, %v463_v0  ;;  %v679_v55 = vsel %vm670_vm9, %v639_v2, %v647_v24 }
 0x1e9   :  { %v554_v32 = vmul.f32 %v1943_v21, %v494_v63  ;;  %v736_v10 = vmul.f32 %v2018_v48, %v679_v55  ;;  %1340 = vrot.lane.b32.xlu0 %v2736_v45, %s1709_s23  ;;  %v858_v55 = vmul.f32 %v2039_v54, %v808_v5 }
 0x1eb   :  { %v570_v36 = vadd.f32 %v554_v32, %v1920_v4  ;;  %v752_v60 = vadd.f32 %v736_v10, %v622_v22  ;;  %v471_v11 = vpop.permute.xlu0 %470  ;;  %v655_v63 = vpop.permute.xlu1 %654  ;;  %v3569_v10 = vsel %vm2270_vm10, %v2283_v26, 0.0 }
 0x1ec   :  { %v490_v18 = vsel %vm484_vm4, %v463_v0, %v471_v11  ;;  %v675_v3 = vsel %vm670_vm9, %v647_v24, %v655_v63  ;;  %v1035_v0 = vmul.f32 %v2094_v41, %v986_v43 }
 0x1ed   :  { %v2832_v19 = vadd.f32 %v611_v9, %v570_v36  ;;  %v873_v56 = vadd.f32 %v857_v61, %v752_v60  ;;  %v515_v22 = vsel %vm2217_vm5, %v490_v18, 0.0  ;;  %v696_v5 = vsel %vm2270_vm10, %v675_v3, 0.0  ;;  %1348 = vrot.lane.b32.xlu0 %v2752_v59, %s1709_s23  ;;  %v3570_v36 = vld [vmem:[#allocation63_spill] sm:$0xff] }
 0x1ee   :  { %v555_v24 = vmul.f32 %v1943_v21, %v515_v22  ;;  %v737_v32 = vmul.f32 %v2018_v48, %v696_v5  ;;  %v1036_v61 = vmul.f32 %v2094_v41, %v3569_v10  ;;  %v612_v9 = vmul.f32 %v1970_v31, %v2358_v29  ;;  %v3571_v5 = vld [vmem:[#allocation70_spill] sm:$0xff] }
 0x1ef   :  { %v613_v60 = vmul.f32 %v1970_v31, %v3570_v36  ;;  %v930_v7 = vadd.f32 %v914_v47, %v873_v56  ;;  %v479_v58 = vpop.permute.xlu0 %478  ;;  %v663_v16 = vpop.permute.xlu1 %662 }
 0x1f0   :  { %v571_v43 = vadd.f32 %v555_v24, %v1920_v4  ;;  %v753_v18 = vadd.f32 %v737_v32, %v2756_v28  ;;  %v486_v3 = vsel %vm484_vm4, %v471_v11, %v479_v58  ;;  %v498_v26 = vsel %vm484_vm4, %v479_v58, %v455_v39 }
 0x1f1   :  { %v513_v22 = vsel %vm2243_vm7, %v498_v26, 0.0  ;;  %v556_v29 = vmul.f32 %v1943_v21, %v486_v3  ;;  %v671_v47 = vsel %vm670_vm9, %v655_v63, %v663_v16  ;;  %v683_v56 = vsel %vm670_vm9, %v663_v16, %v639_v2  ;;  %1336 = vrot.lane.b32.xlu0 %v3571_v5, %s1709_s23  ;;  %v3572_v16 = vld [vmem:[#allocation56_spill] sm:$0xff] }
 0x1f2   :  { %v874_v28 = vadd.f32 %v858_v55, %v753_v18  ;;  %v553_v11 = vmul.f32 %v1943_v21, %v513_v22  ;;  %v698_v39 = vsel %vm2292_vm12, %v683_v56, 0.0  ;;  %v738_v24 = vmul.f32 %v2018_v48, %v671_v47  ;;  %v3573_v22 = vld [vmem:[#allocation54_spill] sm:$0xff]  ;;  %v3577_v56 = vld [vmem:[#allocation9_spill] sm:$0xff] }
 0x1f3   :  { %v572_v32 = vadd.f32 %v556_v29, %v1920_v4  ;;  %v739_v10 = vmul.f32 %v2018_v48, %v698_v39  ;;  %v641_v36 = vpop.permute.xlu0 %640  ;;  %v1141_v63 = vpop.permute.xlu1 %1140  ;;  %v2877_v58 = vadd.f32 %v612_v9, %v571_v43  ;;  %v2879_v2 = vadd.f32 %v1035_v0, %v930_v7  ;;  %v3574_v29 = vld [vmem:[#allocation50_spill] sm:$0xff]  ;;  %v3575_v9 = vld [vmem:[#allocation71_spill] sm:$0xff] }
 0x1f4   :  { %v610_v55 = vmul.f32 %v1970_v31, %v3572_v16  ;;  %v569_v21 = vadd.f32 %v553_v11, %v1920_v4  ;;  %v754_v18 = vadd.f32 %v738_v24, %v2780_v34  ;;  %v931_v3 = vadd.f32 %v915_v35, %v874_v28  ;;  %v3576_v31 = vld [vmem:[#allocation8_spill] sm:$0xff]  ;;  %v3581_v16 = vld [vmem:[#allocation41_spill] sm:$0xff] }
 0x1f5   :  { %v860_v26 = vmul.f32 %v2039_v54, %v800_v25  ;;  %v978_v48 = vsel %vm670_vm9, %v3574_v29, %v3573_v22  ;;  %v2890_v47 = vadd.f32 %v613_v60, %v572_v32  ;;  %v755_v0 = vadd.f32 %v739_v10, %v2788_v51  ;;  %1344 = vrot.lane.b32.xlu0 %v3575_v9, %s1709_s23  ;;  %v3580_v32 = vld [vmem:[#allocation22_spill] sm:$0xff]  ;;  %v3584_v22 = vld [vmem:[#allocation60_spill] sm:$0xff] }
 0x1f6   :  { %v916_v4 = vmul.f32 %v2066_v15, %v3576_v31  ;;  %v875_v7 = vadd.f32 %v859_v17, %v754_v18  ;;  %v626_v34 = vadd.f32 %v610_v55, %v569_v21  ;;  %v1052_v35 = vadd.f32 %v1036_v61, %v931_v3  ;;  %v3578_v17 = vld [vmem:[#allocation55_spill] sm:$0xff]  ;;  %v3582_v21 = vld [vmem:[#allocation57_spill] sm:$0xff] }
 0x1f7   :  { %v876_v43 = vadd.f32 %v860_v26, %v755_v0  ;;  %v649_v54 = vpop.permute.xlu0 %648  ;;  %v1149_v25 = vpop.permute.xlu1 %1148  ;;  %v917_v28 = vmul.f32 %v2066_v15, %v3577_v56  ;;  %v1037_v60 = vmul.f32 %v2094_v41, %v978_v48  ;;  %v3579_v24 = vsel %vm2292_vm12, %v3578_v17, 0.0  ;;  %v3583_v18 = vld [vmem:[#allocation51_spill] sm:$0xff]  ;;  %v3586_v48 = vld [vmem:[#allocation25_spill] sm:$0xff]  ;;  %v3590_v17 = vld [vmem:[#allocation30_spill] sm:$0xff] }
 0x1f8   :  { %v932_v11 = vadd.f32 %v916_v4, %v875_v7  ;;  %v680_v51 = vsel %vm670_vm9, %v641_v36, %v649_v54  ;;  %v1180_v39 = vsel %vm484_vm4, %v1141_v63, %v1149_v25  ;;  %v1038_v61 = vmul.f32 %v2094_v41, %v3579_v24 }
 0x1f9   :  { %v740_v10 = vmul.f32 %v3580_v32, %v680_v51  ;;  %v1230_v55 = vmul.f32 %v3581_v16, %v1180_v39  ;;  %v933_v15 = vadd.f32 %v917_v28, %v876_v43  ;;  %v809_v3 = vsel %vm484_vm4, %v3583_v18, %v3582_v21  ;;  %v3587_v51 = vld [vmem:[#allocation61_spill] sm:$0xff]  ;;  %v3589_v39 = vld [vmem:[#allocation12_spill] sm:$0xff] }
 0x1fa   :  { %v1053_v26 = vadd.f32 %v1037_v60, %v932_v11  ;;  %v3585_v29 = vsel %vm2243_vm7, %v3584_v22, 0.0  ;;  %v3588_v43 = vld [vmem:[#allocation53_spill] sm:$0xff]  ;;  %v918_v24 = vmul.f32 %v3590_v17, %v3589_v39 }
 0x1fb   :  { %v861_v0 = vmul.f32 %v3586_v48, %v3585_v29  ;;  %v756_v31 = vadd.f32 %v740_v10, %v626_v34  ;;  %v2920_v4 = vadd.f32 %v1230_v55, %v1052_v35  ;;  %v657_v41 = vpop.permute.xlu0 %656  ;;  %v1157_v7 = vpop.permute.xlu1 %1156  ;;  %v1054_v56 = vadd.f32 %v1038_v61, %v933_v15  ;;  %v3594_v29 = vld [vmem:[#allocation59_spill] sm:$0xff] }
 0x1fc   :  { %v987_v28 = vsel %vm670_vm9, %v3588_v43, %v3587_v51  ;;  %v676_v60 = vsel %vm670_vm9, %v649_v54, %v657_v41  ;;  %v1176_v11 = vsel %vm484_vm4, %v1149_v25, %v1157_v7  ;;  %v862_v10 = vmul.f32 %v3586_v48, %v809_v3  ;;  %v3591_v54 = vld [vmem:[#allocation20_spill] sm:$0xff]  ;;  %v3592_v25 = vld [vmem:[#allocation58_spill] sm:$0xff] }
 0x1fd   :  { %v877_v34 = vadd.f32 %v861_v0, %v756_v31  ;;  %v700_v35 = vsel %vm2270_vm10, %v676_v60, 0.0  ;;  %v1190_v61 = vsel %vm2217_vm5, %v1176_v11, 0.0  ;;  %v919_v21 = vmul.f32 %v3590_v17, %v3591_v54  ;;  %v3595_v0 = vld [vmem:[#allocation52_spill] sm:$0xff] }
 0x1fe   :  { %v741_v55 = vmul.f32 %v3580_v32, %v700_v35  ;;  %v1231_v15 = vmul.f32 %v3581_v16, %v1190_v61  ;;  %v3593_v18 = vsel %vm2217_vm5, %v3592_v25, 0.0  ;;  %v801_v31 = vsel %vm484_vm4, %v3595_v0, %v3594_v29  ;;  %v3596_v51 = vld [vmem:[#allocation36_spill] sm:$0xff] }
 0x1ff   :  { %v863_v22 = vmul.f32 %v3586_v48, %v3593_v18  ;;  %v1039_v3 = vmul.f32 %v3596_v51, %v987_v28  ;;  %v934_v43 = vadd.f32 %v918_v24, %v877_v34  ;;  %v665_v60 = vpop.permute.xlu0 %664  ;;  %v1165_v11 = vpop.permute.xlu1 %1164 }
 0x200   :  { %v757_v39 = vadd.f32 %v741_v55, %v2832_v19  ;;  %v2952_v35 = vadd.f32 %v1231_v15, %v1053_v26  ;;  %v672_v61 = vsel %vm670_vm9, %v657_v41, %v665_v60  ;;  %v684_v54 = vsel %vm670_vm9, %v665_v60, %v641_v36 }
 0x201   :  { %v702_v25 = vsel %vm2292_vm12, %v684_v54, 0.0  ;;  %v742_v18 = vmul.f32 %v3580_v32, %v672_v61  ;;  %v1172_v28 = vsel %vm484_vm4, %v1157_v7, %v1165_v11  ;;  %v1184_v24 = vsel %vm484_vm4, %v1165_v11, %v1141_v63  ;;  %v3597_v63 = vld [vmem:[#allocation62_spill] sm:$0xff]  ;;  %v3600_v54 = vld [vmem:[#allocation21_spill] sm:$0xff] }
 0x202   :  { %v878_v19 = vadd.f32 %v862_v10, %v757_v39  ;;  %v743_v26 = vmul.f32 %v3580_v32, %v702_v25  ;;  %v1188_v41 = vsel %vm2243_vm7, %v1184_v24, 0.0  ;;  %v1232_v34 = vmul.f32 %v3581_v16, %v1172_v28 }
 0x203   :  { %v864_v36 = vmul.f32 %v3586_v48, %v801_v31  ;;  %v758_v55 = vadd.f32 %v742_v18, %v2877_v58  ;;  %v1229_v15 = vmul.f32 %v3581_v16, %v1188_v41  ;;  %v1143_v29 = vpop.permute.xlu0 %1142  ;;  %v2972_v0 = vpop.permute.xlu1 %1318  ;;  %v1055_v7 = vadd.f32 %v1039_v3, %v934_v43  ;;  %v1677_v58 = vld [vmem:[%s3396_s5] sm:$0xff]   ;;  %v3601_v18 = vld [vmem:[#allocation64_spill] sm:$0xff] }
 0x204   :  { %v3598_v10 = vsel %vm2270_vm10, %v3597_v63, 0.0  ;;  %v759_v60 = vadd.f32 %v743_v26, %v2890_v47  ;;  %v2980_v11 = vadd.f32 %v1232_v34, %v1054_v56  ;;  %v935_v39 = vadd.f32 %v919_v21, %v878_v19  ;;  %v3599_v16 = vld [vmem:[#allocation13_spill] sm:$0xff]  ;;  %v3602_v56 = vld [vmem:[#allocation66_spill] sm:$0xff] }
 0x205   :  { %v1040_v32 = vmul.f32 %v3596_v51, %v3598_v10  ;;  %v920_v48 = vmul.f32 %v3590_v17, %v3599_v16  ;;  %v879_v31 = vadd.f32 %v863_v22, %v758_v55  ;;  %v1245_v3 = vadd.f32 %v1229_v15, %v2879_v2  ;;  %v3603_v21 = vld [vmem:[#allocation46_spill] sm:$0xff]  ;;  %v3604_v22 = vld [vmem:[#allocation65_spill] sm:$0xff]  ;;  %v3606_v15 = vld [vmem:[#allocation40_spill] sm:$0xff] }
 0x206   :  { %v880_v43 = vadd.f32 %v864_v36, %v759_v60  ;;  %v921_v25 = vmul.f32 %v3590_v17, %v3600_v54  ;;  %v1041_v47 = vmul.f32 %v3596_v51, %v3601_v18  ;;  %v1286_v28 = vmul.f32 %v3603_v21, %v3602_v56  ;;  %v1678_v55 = vld [vmem:[%s3396_s5 + $0x8] sm:$0xff]   ;;  %v3608_v16 = vld [vmem:[#allocation45_spill] sm:$0xff] }
 0x207   :  { %v1056_v61 = vadd.f32 %v1040_v32, %v935_v39  ;;  %v936_v24 = vadd.f32 %v920_v48, %v879_v31  ;;  %v1151_v19 = vpop.permute.xlu0 %1150  ;;  %v2994_v26 = vpop.permute.xlu1 %1326  ;;  %v3605_v41 = vsel %vm2292_vm12, %v3604_v22, 0.0  ;;  %v3607_v32 = vld [vmem:[#allocation49_spill] sm:$0xff]  ;;  %v1291_v48 = vmul.f32 %v3608_v16, %v2473_v38 }
 0x208   :  { %v1042_v2 = vmul.f32 %v3596_v51, %v3605_v41  ;;  %v1181_v34 = vsel %vm484_vm4, %v1143_v29, %v1151_v19  ;;  %v1358_v17 = vsel %vm670_vm9, %v2972_v0, %v2994_v26  ;;  %v937_v36 = vadd.f32 %v921_v25, %v880_v43  ;;  %1495 = vxpose.xlu1.c.b16.start [1/2] (short) (narrow) %v1677_v58, 16 }
 0x209   :  { %v1234_v63 = vmul.f32 %v3606_v15, %v1181_v34  ;;  %v1302_v10 = vadd.f32 %v1286_v28, %v1245_v3  ;;  %v1407_v60 = vmul.f32 %v3607_v32, %v1358_v17  ;;  %v1057_v51 = vadd.f32 %v1041_v47, %v936_v24  ;;  %v3613_v34 = vld [vmem:[#allocation69_spill] sm:$0xff] }
 0x20a   :  { %v1058_v39 = vadd.f32 %v1042_v2, %v937_v36  ;;  %v1290_v17 = vmul.f32 %v3608_v16, %v3613_v34  ;;  %v3639_v16 = vld [vmem:[#allocation34_spill] sm:$0xff] }
 0x20b   :  { %v1250_v31 = vadd.f32 %v1234_v63, %v1056_v61  ;;  %v1423_v54 = vadd.f32 %v1407_v60, %v1302_v10  ;;  %v1159_v18 = vpop.permute.xlu0 %1158  ;;  %v3614_v60 = vld [vmem:[#allocation48_spill] sm:$0xff] }
 0x20c   :  { %v1177_v58 = vsel %vm484_vm4, %v1151_v19, %v1159_v18  ;;  %1496 = vxpose.xlu1.c.b16.end [2/2] (short) (narrow) %v1678_v55, 16 }
 0x20d   :  { %v3016_v43 = vadd.f32 %v1291_v48, %v1250_v31  ;;  %v1194_v25 = vsel %vm2217_vm5, %v1177_v58, 0.0  ;;  %v3616_v31 = vld [vmem:[#allocation15_spill] sm:$0xff] }
 0x20e   :  { %v1235_v3 = vmul.f32 %v3606_v15, %v1194_v25  ;;  %v3617_v25 = vld [vmem:[#allocation7_spill] sm:$0xff] }
 0x20f   :  { %3609 = vst [vmem:[#allocation63_spill] sm:$0xff] %v3016_v43  ;;  %v1167_v56 = vpop.permute.xlu0 %1166 }
 0x210   :  { %v3021_v47 = vadd.f32 %v1235_v3, %v1057_v51  ;;  %v1173_v38 = vsel %vm484_vm4, %v1159_v18, %v1167_v56  ;;  %v1185_v61 = vsel %vm484_vm4, %v1167_v56, %v1143_v29  ;;  %v615_v18 = vmul.f32 %v3616_v31, %v2520_v23 }
 0x211   :  { %v1192_v28 = vsel %vm2243_vm7, %v1185_v61, 0.0  ;;  %v1236_v24 = vmul.f32 %v3606_v15, %v1173_v38 }
 0x212   :  { %3610 = vst [vmem:[#allocation70_spill] sm:$0xff] %v3021_v47  ;;  %v1233_v19 = vmul.f32 %v3606_v15, %v1192_v28 }
 0x213   :  { %v3031_v22 = vadd.f32 %v1236_v24, %v1058_v39  ;;  %v3033_v41 = vpop.permute.xlu0 %1320  ;;  %v457_v2 = vpop.permute.xlu1 %456  ;;  %v3615_v39 = vld [vmem:[#allocation11_spill] sm:$0xff] }
 0x214   :  { %3612 = vst [vmem:[#allocation54_spill] sm:$0xff] %v3033_v41  ;;  %v1249_v36 = vadd.f32 %v1233_v19, %v1055_v7  ;;  %v1439_v7 = vmax.f32 %v1423_v54, 0.0  ;;  %v616_v54 = vmul.f32 %v3616_v31, %v2541_v6  ;;  %v617_v6 = vmul.f32 %v3616_v31, %v2560_v20  ;;  %v3620_v20 = vld [vmem:[#allocation10_spill] sm:$0xff] }
 0x215   :  { %3611 = vst [vmem:[#allocation56_spill] sm:$0xff] %v3031_v22 }
 0x216   :  { %v1306_v55 = vadd.f32 %v1290_v17, %v1249_v36  ;;  %v3055_v34 = vmin.f32 %v1439_v7, 6.0 }
 0x217   :  { %v3037_v63 = vpop.permute.xlu0 %1328  ;;  %v465_v29 = vpop.permute.xlu1 %464 }
 0x218   :  { %v1359_v10 = vsel %vm670_vm9, %v3033_v41, %v3037_v63  ;;  %v495_v15 = vsel %vm484_vm4, %v457_v2, %v465_v29  ;;  %3618 = vst [vmem:[#allocation50_spill] sm:$0xff] %v3055_v34  ;;  %v3633_v41 = vld [vmem:[#allocation77_spill] sm:$0xff] }
 0x219   :  { %v1411_v51 = vmul.f32 %v3614_v60, %v1359_v10  ;;  %v558_v48 = vmul.f32 %v3615_v39, %v495_v15 }
 0x21b   :  { %v1427_v58 = vadd.f32 %v1411_v51, %v1306_v55  ;;  %v574_v3 = vadd.f32 %v558_v48, %v3617_v25  ;;  %v473_v56 = vpop.permute.xlu1 %472  ;;  %v3673_v27 = vld [vmem:[#allocation54_spill] sm:$0xff] }
 0x21c   :  { %v491_v38 = vsel %vm484_vm4, %v465_v29, %v473_v56 }
 0x21d   :  { %v1443_v61 = vmax.f32 %v1427_v58, 0.0  ;;  %v631_v28 = vadd.f32 %v615_v18, %v574_v3  ;;  %v519_v24 = vsel %vm2217_vm5, %v491_v38, 0.0 }
 0x21e   :  { %v559_v19 = vmul.f32 %v3615_v39, %v519_v24 }
 0x21f   :  { %v3057_v17 = vmin.f32 %v1443_v61, 6.0  ;;  %v481_v23 = vpop.permute.xlu1 %480 }
 0x220   :  { %v575_v36 = vadd.f32 %v559_v19, %v3617_v25  ;;  %v487_v55 = vsel %vm484_vm4, %v473_v56, %v481_v23  ;;  %v499_v29 = vsel %vm484_vm4, %v481_v23, %v457_v2  ;;  %v614_v2 = vmul.f32 %v3616_v31, %v2502_v30  ;;  %v3624_v30 = vld [vmem:[#allocation75_spill] sm:$0xff] }
 0x221   :  { %3619 = vst [vmem:[#allocation8_spill] sm:$0xff] %v3057_v17  ;;  %v517_v10 = vsel %vm2243_vm7, %v499_v29, 0.0  ;;  %v560_v15 = vmul.f32 %v3615_v39, %v487_v55  ;;  %v3622_v29 = vld [vmem:[#allocation28_spill] sm:$0xff]  ;;  %v3625_v31 = vsel %vm2243_vm7, %v3624_v30, 0.0  ;;  %v3630_v30 = vld [vmem:[#allocation31_spill] sm:$0xff] }
 0x222   :  { %v557_v48 = vmul.f32 %v3615_v39, %v517_v10  ;;  %v632_v18 = vadd.f32 %v616_v54, %v575_v36  ;;  %v3621_v36 = vld [vmem:[#allocation17_spill] sm:$0xff]  ;;  %v3623_v10 = vld [vmem:[#allocation24_spill] sm:$0xff] }
 0x223   :  { %v576_v7 = vadd.f32 %v560_v15, %v3617_v25  ;;  %v459_v58 = vpop.permute.xlu0 %458  ;;  %v643_v3 = vpop.permute.xlu1 %642  ;;  %v922_v15 = vmul.f32 %v3623_v10, %v3622_v29 }
 0x224   :  { %v573_v56 = vadd.f32 %v557_v48, %v3617_v25  ;;  %v3626_v25 = vld [vmem:[#allocation19_spill] sm:$0xff] }
 0x225   :  { %v633_v38 = vadd.f32 %v617_v6, %v576_v7  ;;  %v865_v48 = vmul.f32 %v3626_v25, %v3625_v31  ;;  %v3627_v6 = vld [vmem:[#allocation14_spill] sm:$0xff]  ;;  %v923_v31 = vmul.f32 %v3623_v10, %v3630_v30 }
 0x226   :  { %v630_v61 = vadd.f32 %v614_v2, %v573_v56  ;;  %v619_v7 = vmul.f32 %v3627_v6, %v2600_v13  ;;  %v3628_v2 = vld [vmem:[#allocation6_spill] sm:$0xff] }
 0x227   :  { %v467_v24 = vpop.permute.xlu0 %466  ;;  %v651_v19 = vpop.permute.xlu1 %650 }
 0x228   :  { %v496_v39 = vsel %vm484_vm4, %v459_v58, %v467_v24  ;;  %v681_v23 = vsel %vm670_vm9, %v643_v3, %v651_v19 }
 0x229   :  { %v562_v54 = vmul.f32 %v3620_v20, %v496_v39  ;;  %v744_v55 = vmul.f32 %v3621_v36, %v681_v23  ;;  %v3629_v39 = vld [vmem:[#allocation73_spill] sm:$0xff] }
 0x22a   :  { %v866_v23 = vmul.f32 %v3626_v25, %v3629_v39 }
 0x22b   :  { %v578_v56 = vadd.f32 %v562_v54, %v3628_v2  ;;  %v760_v51 = vadd.f32 %v744_v55, %v630_v61  ;;  %v475_v34 = vpop.permute.xlu0 %474  ;;  %v659_v17 = vpop.permute.xlu1 %658  ;;  %v3631_v55 = vld [vmem:[#allocation72_spill] sm:$0xff] }
 0x22c   :  { %v492_v29 = vsel %vm484_vm4, %v467_v24, %v475_v34  ;;  %v677_v22 = vsel %vm670_vm9, %v651_v19, %v659_v17  ;;  %v3632_v39 = vsel %vm2217_vm5, %v3631_v55, 0.0  ;;  %v3634_v19 = vld [vmem:[#allocation27_spill] sm:$0xff] }
 0x22d   :  { %v3102_v47 = vadd.f32 %v619_v7, %v578_v56  ;;  %v881_v13 = vadd.f32 %v865_v48, %v760_v51  ;;  %v523_v61 = vsel %vm2217_vm5, %v492_v29, 0.0  ;;  %v704_v54 = vsel %vm2270_vm10, %v677_v22, 0.0  ;;  %v3635_v48 = vld [vmem:[#allocation76_spill] sm:$0xff] }
 0x22e   :  { %v867_v24 = vmul.f32 %v3626_v25, %v3632_v39  ;;  %v1043_v43 = vmul.f32 %v3634_v19, %v3633_v41  ;;  %v563_v30 = vmul.f32 %v3620_v20, %v523_v61  ;;  %v745_v7 = vmul.f32 %v3621_v36, %v704_v54 }
 0x22f   :  { %v620_v51 = vmul.f32 %v3627_v6, %v2622_v57  ;;  %v3636_v22 = vsel %vm2270_vm10, %v3635_v48, 0.0  ;;  %v621_v29 = vmul.f32 %v3627_v6, %v2644_v14  ;;  %v938_v55 = vadd.f32 %v922_v15, %v881_v13  ;;  %v483_v39 = vpop.permute.xlu0 %482  ;;  %v667_v60 = vpop.permute.xlu1 %666 }
 0x230   :  { %v1044_v56 = vmul.f32 %v3634_v19, %v3636_v22  ;;  %v579_v41 = vadd.f32 %v563_v30, %v3628_v2  ;;  %v761_v61 = vadd.f32 %v745_v7, %v631_v28  ;;  %v488_v54 = vsel %vm484_vm4, %v475_v34, %v483_v39 }
 0x231   :  { %v500_v57 = vsel %vm484_vm4, %v483_v39, %v459_v58  ;;  %v564_v22 = vmul.f32 %v3620_v20, %v488_v54  ;;  %v673_v14 = vsel %vm670_vm9, %v659_v17, %v667_v60  ;;  %v685_v15 = vsel %vm670_vm9, %v667_v60, %v643_v3 }
 0x232   :  { %v521_v48 = vsel %vm2243_vm7, %v500_v57, 0.0  ;;  %v882_v13 = vadd.f32 %v866_v23, %v761_v61  ;;  %v706_v34 = vsel %vm2292_vm12, %v685_v15, 0.0  ;;  %v746_v30 = vmul.f32 %v3621_v36, %v673_v14  ;;  %v3637_v23 = vld [vmem:[#allocation74_spill] sm:$0xff] }
 0x233   :  { %v561_v28 = vmul.f32 %v3620_v20, %v521_v48  ;;  %v580_v58 = vadd.f32 %v564_v22, %v3628_v2  ;;  %v747_v7 = vmul.f32 %v3621_v36, %v706_v34  ;;  %v645_v39 = vpop.permute.xlu0 %644  ;;  %v1145_v54 = vpop.permute.xlu1 %1144  ;;  %v636_v57 = vadd.f32 %v620_v51, %v579_v41  ;;  %v3638_v22 = vld [vmem:[#allocation29_spill] sm:$0xff] }
 0x234   :  { %v3144_v9 = vadd.f32 %v1043_v43, %v938_v55  ;;  %v618_v60 = vmul.f32 %v3627_v6, %v2579_v46  ;;  %v762_v3 = vadd.f32 %v746_v30, %v632_v18  ;;  %v939_v20 = vadd.f32 %v923_v31, %v882_v13 }
 0x235   :  { %v577_v17 = vadd.f32 %v561_v28, %v3628_v2  ;;  %v868_v61 = vmul.f32 %v3626_v25, %v3637_v23  ;;  %v637_v48 = vadd.f32 %v621_v29, %v580_v58  ;;  %v763_v14 = vadd.f32 %v747_v7, %v633_v38  ;;  %v3642_v29 = vld [vmem:[#allocation33_spill] sm:$0xff]  ;;  %v3644_v28 = vld [vmem:[#allocation18_spill] sm:$0xff]  ;;  %v3646_v23 = vld [vmem:[#allocation23_spill] sm:$0xff] }
 0x236   :  { %v924_v36 = vmul.f32 %v3623_v10, %v3638_v22  ;;  %v883_v15 = vadd.f32 %v867_v24, %v762_v3  ;;  %v1060_v51 = vadd.f32 %v1044_v56, %v939_v20  ;;  %v925_v46 = vmul.f32 %v3623_v10, %v3639_v16  ;;  %v3641_v24 = vld [vmem:[#allocation16_spill] sm:$0xff]  ;;  %v3645_v20 = vld [vmem:[#allocation35_spill] sm:$0xff] }
 0x237   :  { %v634_v34 = vadd.f32 %v618_v60, %v577_v17  ;;  %v884_v43 = vadd.f32 %v868_v61, %v763_v14  ;;  %v653_v55 = vpop.permute.xlu0 %652  ;;  %v1153_v41 = vpop.permute.xlu1 %1152  ;;  %v1045_v18 = vmul.f32 %v3634_v19, %v2571_v53  ;;  %v3640_v2 = vsel %vm2292_vm12, %v2575_v50, 0.0 }
 0x238   :  { %v940_v6 = vadd.f32 %v924_v36, %v883_v15  ;;  %v682_v25 = vsel %vm670_vm9, %v645_v39, %v653_v55  ;;  %v1182_v38 = vsel %vm484_vm4, %v1145_v54, %v1153_v41  ;;  %v1046_v31 = vmul.f32 %v3634_v19, %v3640_v2 }
 0x239   :  { %v748_v56 = vmul.f32 %v3641_v24, %v682_v25  ;;  %v1238_v16 = vmul.f32 %v3642_v29, %v1182_v38  ;;  %v941_v10 = vadd.f32 %v925_v46, %v884_v43  ;;  %v3643_v53 = vsel %vm2243_vm7, %v2618_v42, 0.0  ;;  %v3648_v43 = vld [vmem:[#allocation79_spill] sm:$0xff]  ;;  %v3652_v25 = vld [vmem:[#allocation26_spill] sm:$0xff] }
 0x23a   :  { %v1061_v13 = vadd.f32 %v1045_v18, %v940_v6  ;;  %v869_v30 = vmul.f32 %v3644_v28, %v3643_v53  ;;  %v926_v61 = vmul.f32 %v3646_v23, %v3645_v20  ;;  %v3651_v6 = vld [vmem:[#allocation82_spill] sm:$0xff] }
 0x23b   :  { %v764_v58 = vadd.f32 %v748_v56, %v634_v34  ;;  %v3173_v7 = vadd.f32 %v1238_v16, %v1060_v51  ;;  %v661_v60 = vpop.permute.xlu0 %660  ;;  %v1161_v17 = vpop.permute.xlu1 %1160  ;;  %v1062_v50 = vadd.f32 %v1046_v31, %v941_v10  ;;  %v3647_v34 = vld [vmem:[#allocation44_spill] sm:$0xff]  ;;  %v1047_v38 = vmul.f32 %v3652_v25, %v3651_v6 }
 0x23c   :  { %v678_v19 = vsel %vm670_vm9, %v653_v55, %v661_v60  ;;  %v1178_v3 = vsel %vm484_vm4, %v1153_v41, %v1161_v17  ;;  %v927_v51 = vmul.f32 %v3646_v23, %v3647_v34  ;;  %v870_v55 = vmul.f32 %v3644_v28, %v3648_v43  ;;  %v3649_v41 = vld [vmem:[#allocation78_spill] sm:$0xff] }
 0x23d   :  { %v885_v14 = vadd.f32 %v869_v30, %v764_v58  ;;  %v708_v42 = vsel %vm2270_vm10, %v678_v19, 0.0  ;;  %v1198_v22 = vsel %vm2217_vm5, %v1178_v3, 0.0  ;;  %v3650_v46 = vsel %vm2217_vm5, %v3649_v41, 0.0 }
 0x23e   :  { %v749_v36 = vmul.f32 %v3641_v24, %v708_v42  ;;  %v1239_v15 = vmul.f32 %v3642_v29, %v1198_v22  ;;  %v871_v18 = vmul.f32 %v3644_v28, %v3650_v46  ;;  %v3656_v46 = vld [vmem:[#allocation37_spill] sm:$0xff] }
 0x23f   :  { %v942_v2 = vadd.f32 %v926_v61, %v885_v14  ;;  %v669_v31 = vpop.permute.xlu0 %668  ;;  %v1169_v56 = vpop.permute.xlu1 %1168  ;;  %v928_v6 = vmul.f32 %v3646_v23, %v3656_v46 }
 0x240   :  { %v765_v16 = vadd.f32 %v749_v36, %v3102_v47  ;;  %v3199_v10 = vadd.f32 %v1239_v15, %v1061_v13  ;;  %v674_v53 = vsel %vm670_vm9, %v661_v60, %v669_v31  ;;  %v686_v30 = vsel %vm670_vm9, %v669_v31, %v645_v39  ;;  %v3653_v39 = vld [vmem:[#allocation80_spill] sm:$0xff] }
 0x241   :  { %v710_v58 = vsel %vm2292_vm12, %v686_v30, 0.0  ;;  %v750_v19 = vmul.f32 %v3641_v24, %v674_v53  ;;  %v1174_v3 = vsel %vm484_vm4, %v1161_v17, %v1169_v56  ;;  %v1186_v20 = vsel %vm484_vm4, %v1169_v56, %v1145_v54  ;;  %v3654_v54 = vld [vmem:[#allocation81_spill] sm:$0xff]  ;;  %v3657_v56 = vld [vmem:[#allocation47_spill] sm:$0xff] }
 0x242   :  { %v886_v47 = vadd.f32 %v870_v55, %v765_v16  ;;  %v751_v13 = vmul.f32 %v3641_v24, %v710_v58  ;;  %v1196_v60 = vsel %vm2243_vm7, %v1186_v20, 0.0  ;;  %v1240_v61 = vmul.f32 %v3642_v29, %v1174_v3  ;;  %v3659_v53 = vld [vmem:[#allocation83_spill] sm:$0xff]  ;;  %v3660_v58 = vld [vmem:[#allocation84_spill] sm:$0xff] }
 0x243   :  { %v872_v14 = vmul.f32 %v3644_v28, %v3653_v39  ;;  %v766_v42 = vadd.f32 %v750_v19, %v636_v57  ;;  %v1237_v22 = vmul.f32 %v3642_v29, %v1196_v60  ;;  %v1147_v36 = vpop.permute.xlu0 %1146  ;;  %v1323_v15 = vpop.permute.xlu1 %1322  ;;  %v3219_v17 = vadd.f32 %v1047_v38, %v942_v2  ;;  %v3658_v2 = vld [vmem:[#allocation39_spill] sm:$0xff] }
 0x244   :  { %v3655_v34 = vsel %vm2270_vm10, %v3654_v54, 0.0  ;;  %v767_v43 = vadd.f32 %v751_v13, %v637_v48  ;;  %v1256_v55 = vadd.f32 %v1240_v61, %v1062_v50  ;;  %v943_v41 = vadd.f32 %v927_v51, %v886_v47  ;;  %v3663_v13 = vld [vmem:[#allocation43_spill] sm:$0xff] }
 0x245   :  { %v1048_v24 = vmul.f32 %v3652_v25, %v3655_v34  ;;  %v887_v28 = vadd.f32 %v871_v18, %v766_v42  ;;  %v1253_v57 = vadd.f32 %v1237_v22, %v3144_v9  ;;  %v929_v38 = vmul.f32 %v3646_v23, %v3657_v56 }
 0x246   :  { %v888_v29 = vadd.f32 %v872_v14, %v767_v43  ;;  %v1294_v16 = vmul.f32 %v3658_v2, %v2667_v44  ;;  %v1049_v30 = vmul.f32 %v3652_v25, %v3659_v53  ;;  %v3661_v18 = vsel %vm2292_vm12, %v3660_v58, 0.0  ;;  %v3662_v44 = vld [vmem:[#allocation32_spill] sm:$0xff]  ;;  %v3664_v14 = vld [vmem:[#allocation38_spill] sm:$0xff] }
 0x247   :  { %v1064_v31 = vadd.f32 %v1048_v24, %v943_v41  ;;  %v944_v48 = vadd.f32 %v928_v6, %v887_v28  ;;  %v1155_v50 = vpop.permute.xlu0 %1154  ;;  %v1331_v51 = vpop.permute.xlu1 %1330  ;;  %v1050_v9 = vmul.f32 %v3652_v25, %v3661_v18  ;;  %v1299_v42 = vmul.f32 %v3664_v14, %v2726_v49  ;;  %v3665_v24 = vld [vmem:[#allocation85_spill] sm:$0xff] }
 0x248   :  { %v1183_v19 = vsel %vm484_vm4, %v1147_v36, %v1155_v50  ;;  %v1360_v23 = vsel %vm670_vm9, %v1323_v15, %v1331_v51  ;;  %v945_v3 = vadd.f32 %v929_v38, %v888_v29  ;;  %v1310_v47 = vadd.f32 %v1294_v16, %v1253_v57  ;;  %v3666_v57 = vld [vmem:[#allocation67_spill] sm:$0xff] }
 0x249   :  { %v1242_v20 = vmul.f32 %v3662_v44, %v1183_v19  ;;  %v1415_v60 = vmul.f32 %v3663_v13, %v1360_v23  ;;  %v1065_v61 = vadd.f32 %v1049_v30, %v944_v48  ;;  %v1295_v43 = vmul.f32 %v3658_v2, %v3665_v24 }
 0x24a   :  { %v1066_v39 = vadd.f32 %v1050_v9, %v945_v3  ;;  %v1287_v29 = vmul.f32 %v3603_v21, %v3666_v57  ;;  %v1296_v16 = vmul.f32 %v3658_v2, %v2694_v52  ;;  %v1297_v53 = vmul.f32 %v3658_v2, %v2706_v40 }
 0x24b   :  { %v1258_v22 = vadd.f32 %v1242_v20, %v1064_v31  ;;  %v3248_v54 = vadd.f32 %v1415_v60, %v1310_v47  ;;  %v1163_v25 = vpop.permute.xlu0 %1162  ;;  %v1339_v34 = vpop.permute.xlu1 %1338  ;;  %v1311_v31 = vadd.f32 %v1295_v43, %v3173_v7  ;;  %v1300_v33 = vmul.f32 %v3664_v14, %v2736_v45 }
 0x24c   :  { %v1179_v41 = vsel %vm484_vm4, %v1155_v50, %v1163_v25  ;;  %v1356_v46 = vsel %vm670_vm9, %v1331_v51, %v1339_v34  ;;  %v1301_v30 = vmul.f32 %v3664_v14, %v2752_v59  ;;  %v1312_v9 = vadd.f32 %v1296_v16, %v3199_v10 }
 0x24d   :  { %v3256_v6 = vadd.f32 %v1299_v42, %v1258_v22  ;;  %v1202_v28 = vsel %vm2217_vm5, %v1179_v41, 0.0  ;;  %v1375_v49 = vsel %vm2270_vm10, %v1356_v46, 0.0  ;;  %v1313_v23 = vadd.f32 %v1297_v53, %v1256_v55 }
 0x24e   :  { %v1243_v56 = vmul.f32 %v3662_v44, %v1202_v28  ;;  %v1416_v38 = vmul.f32 %v3663_v13, %v1375_v49  ;;  %v1289_v24 = vmul.f32 %v3603_v21, %v2450_v8 }
 0x24f   :  { %v1171_v48 = vpop.permute.xlu0 %1170  ;;  %v1347_v50 = vpop.permute.xlu1 %1346 }
 0x250   :  { %v1259_v51 = vadd.f32 %v1243_v56, %v1065_v61  ;;  %v3275_v7 = vadd.f32 %v1416_v38, %v1311_v31  ;;  %v1175_v58 = vsel %vm484_vm4, %v1163_v25, %v1171_v48  ;;  %v1187_v52 = vsel %vm484_vm4, %v1171_v48, %v1147_v36 }
 0x251   :  { %v1200_v40 = vsel %vm2243_vm7, %v1187_v52, 0.0  ;;  %v1244_v2 = vmul.f32 %v3662_v44, %v1175_v58  ;;  %v1352_v45 = vsel %vm670_vm9, %v1339_v34, %v1347_v50  ;;  %v1364_v59 = vsel %vm670_vm9, %v1347_v50, %v1323_v15  ;;  %v3667_v34 = vld [vmem:[#allocation68_spill] sm:$0xff] }
 0x252   :  { %v1241_v18 = vmul.f32 %v3662_v44, %v1200_v40  ;;  %v1377_v19 = vsel %vm2292_vm12, %v1364_v59, 0.0  ;;  %v1417_v36 = vmul.f32 %v3663_v13, %v1352_v45  ;;  %v1316_v60 = vadd.f32 %v1300_v33, %v1259_v51 }
 0x253   :  { %v1260_v12 = vadd.f32 %v1244_v2, %v1066_v39  ;;  %v1418_v3 = vmul.f32 %v3663_v13, %v1377_v19  ;;  %v1325_v20 = vpop.permute.xlu0 %1324  ;;  %v1335_v47 = vpop.permute.xlu1 %1334  ;;  %v1298_v61 = vmul.f32 %v3664_v14, %v2716_v37  ;;  %v1303_v13 = vadd.f32 %v1287_v29, %v2920_v4  ;;  %v3668_v4 = vld [vmem:[#allocation42_spill] sm:$0xff] }
 0x254   :  { %v1257_v15 = vadd.f32 %v1241_v18, %v3219_v17  ;;  %v1433_v44 = vadd.f32 %v1417_v36, %v1312_v9  ;;  %v1354_v10 = vsel %vm670_vm9, %v2994_v26, %v1335_v47  ;;  %v1288_v37 = vmul.f32 %v3603_v21, %v3667_v34  ;;  %v3672_v34 = vld [vmem:[#allocation63_spill] sm:$0xff] }
 0x255   :  { %v1317_v42 = vadd.f32 %v1301_v30, %v1260_v12  ;;  %v1434_v22 = vadd.f32 %v1418_v3, %v1313_v23  ;;  %v1367_v55 = vsel %vm2270_vm10, %v1354_v10, 0.0  ;;  %v1305_v8 = vadd.f32 %v1289_v24, %v2980_v11  ;;  %v3669_v3 = vld [vmem:[#allocation45_spill] sm:$0xff]  ;;  %v3674_v24 = vld [vmem:[#allocation70_spill] sm:$0xff] }
 0x256   :  { %v1408_v39 = vmul.f32 %v3607_v32, %v1367_v55  ;;  %v1314_v25 = vadd.f32 %v1298_v61, %v1257_v15  ;;  %v1304_v28 = vadd.f32 %v1288_v37, %v2952_v35  ;;  %v1447_v29 = vmax.f32 %v3248_v54, 0.0  ;;  %v3670_v15 = vld [vmem:[#allocation71_spill] sm:$0xff] }
 0x257   :  { %v1333_v14 = vpop.permute.xlu0 %1332  ;;  %v1343_v17 = vpop.permute.xlu1 %1342  ;;  %v1448_v50 = vmax.f32 %v3275_v7, 0.0  ;;  %v1449_v18 = vmax.f32 %v1433_v44, 0.0  ;;  %v1450_v9 = vmax.f32 %v1434_v22, 0.0  ;;  %v1293_v44 = vmul.f32 %v3669_v3, %v3670_v15  ;;  %v1682_v15 = vld [vmem:[%s3391_s0 + $0x18] sm:$0xff] }
 0x258   :  { %v3308_v43 = vadd.f32 %v1408_v39, %v1303_v13  ;;  %v1361_v26 = vsel %vm670_vm9, %v1325_v20, %v1333_v14  ;;  %v1350_v41 = vsel %vm670_vm9, %v1335_v47, %v1343_v17  ;;  %v1362_v49 = vsel %vm670_vm9, %v1343_v17, %v2972_v0 }
 0x259   :  { %v1419_v46 = vmul.f32 %v3668_v4, %v1361_v26  ;;  %v1409_v57 = vmul.f32 %v3607_v32, %v1350_v41  ;;  %v1369_v21 = vsel %vm2292_vm12, %v1362_v49, 0.0  ;;  %v1463_v30 = vmin.f32 %v1447_v29, 6.0 }
 0x25a   :  { %v1410_v56 = vmul.f32 %v3607_v32, %v1369_v21  ;;  %v1464_v23 = vmin.f32 %v1448_v50, 6.0  ;;  %v1465_v55 = vmin.f32 %v1449_v18, 6.0  ;;  %v1440_v13 = vmax.f32 %v3308_v43, 0.0  ;;  %v3677_v50 = vld [vmem:[#allocation50_spill] sm:$0xff] }
 0x25b   :  { %v1435_v31 = vadd.f32 %v1419_v46, %v1314_v25  ;;  %v3325_v38 = vadd.f32 %v1409_v57, %v1304_v28  ;;  %v1341_v16 = vpop.permute.xlu0 %1340  ;;  %v1466_v25 = vmin.f32 %v1450_v9, 6.0  ;;  %v3675_v46 = vld [vmem:[#allocation56_spill] sm:$0xff] }
 0x25c   :  { %v1357_v35 = vsel %vm670_vm9, %v1333_v14, %v1341_v16  ;;  %v3329_v0 = vadd.f32 %v1410_v56, %v1305_v8  ;;  %v1309_v28 = vadd.f32 %v1293_v44, %v3675_v46  ;;  %v1456_v56 = vmin.f32 %v1440_v13, 6.0 }
 0x25d   :  { %v1451_v53 = vmax.f32 %v1435_v31, 0.0  ;;  %v1379_v11 = vsel %vm2270_vm10, %v1357_v35, 0.0  ;;  %v1441_v62 = vmax.f32 %v3325_v38, 0.0 }
 0x25e   :  { %v1420_v33 = vmul.f32 %v3668_v4, %v1379_v11  ;;  %v1442_v29 = vmax.f32 %v3329_v0, 0.0 }
 0x25f   :  { %v1467_v48 = vmin.f32 %v1451_v53, 6.0  ;;  %v1349_v54 = vpop.permute.xlu0 %1348  ;;  %v1457_v11 = vmin.f32 %v1441_v62, 6.0 }
 0x260   :  { %v1436_v32 = vadd.f32 %v1420_v33, %v3256_v6  ;;  %v1353_v51 = vsel %vm670_vm9, %v1341_v16, %v1349_v54  ;;  %v1365_v58 = vsel %vm670_vm9, %v1349_v54, %v1325_v20  ;;  %v1292_v20 = vmul.f32 %v3669_v3, %v3571_v5  ;;  %v3676_v54 = vld [vmem:[#allocation8_spill] sm:$0xff]  ;;  %v1681_v3 = vld [vmem:[%s3391_s0 + $0x10] sm:$0xff] }
 0x261   :  { %v1381_v52 = vsel %vm2292_vm12, %v1365_v58, 0.0  ;;  %v1421_v40 = vmul.f32 %v3668_v4, %v1353_v51  ;;  %v1479_v2 = vpack.c.bf16 %v1467_v48, %v1463_v30  ;;  %v1458_v30 = vmin.f32 %v1442_v29, 6.0 }
 0x262   :  { %v1452_v45 = vmax.f32 %v1436_v32, 0.0  ;;  %v1422_v59 = vmul.f32 %v3668_v4, %v1381_v52  ;;  %v1308_v26 = vadd.f32 %v1292_v20, %v3674_v24  ;;  %v3678_v32 = vpack.c.bf16 %v3676_v54, %v3677_v50  ;;  %v3679_v52 = vld [vmem:[#allocation5_spill] sm:$0xff] }
 0x263   :  { %v1437_v7 = vadd.f32 %v1421_v40, %v1316_v60  ;;  %v1337_v19 = vpop.permute.xlu0 %1336  ;;  %v3671_v60 = vld [vmem:[#allocation48_spill] sm:$0xff] }
 0x264   :  { %v1438_v6 = vadd.f32 %v1422_v59, %v1317_v42  ;;  %v1355_v36 = vsel %vm670_vm9, %v3037_v63, %v1337_v19  ;;  %v1468_v12 = vmin.f32 %v1452_v45, 6.0  ;;  %v1679_v45 = vld [vmem:[%s3391_s0] sm:$0xff] }
 0x265   :  { %v1453_v47 = vmax.f32 %v1437_v7, 0.0  ;;  %v1371_v61 = vsel %vm2270_vm10, %v1355_v36, 0.0 }
 0x266   :  { %v1454_v10 = vmax.f32 %v1438_v6, 0.0  ;;  %v1412_v22 = vmul.f32 %v3671_v60, %v1371_v61  ;;  %v1480_v42 = vpack.c.bf16 %v1468_v12, %v1464_v23 }
 0x267   :  { %v1469_v63 = vmin.f32 %v1453_v47, 6.0  ;;  %v1345_v39 = vpop.permute.xlu0 %1344 }
 0x268   :  { %v1428_v37 = vadd.f32 %v1412_v22, %v3672_v34  ;;  %v1351_v5 = vsel %vm670_vm9, %v1337_v19, %v1345_v39  ;;  %v1363_v14 = vsel %vm670_vm9, %v1345_v39, %v3673_v27  ;;  %1527 = vmatprep.subr.bf16.mxu0 %v1480_v42  ;;  %v1470_v17 = vmin.f32 %v1454_v10, 6.0  ;;  %v1680_v19 = vld [vmem:[%s3391_s0 + $0x8] sm:$0xff] }
 0x269   :  { %v1373_v41 = vsel %vm2292_vm12, %v1363_v14, 0.0  ;;  %v1413_v43 = vmul.f32 %v3671_v60, %v1351_v5  ;;  %1528 = vmatpush1.bf16.msra.mxu0 %v1479_v2  ;;  %v1481_v4 = vpack.c.bf16 %v1469_v63, %v1465_v55 }
 0x26a   :  { %v1444_v49 = vmax.f32 %v1428_v37, 0.0  ;;  %v1414_v57 = vmul.f32 %v3671_v60, %v1373_v41  ;;  %v1482_v8 = vpack.c.bf16 %v1470_v17, %v1466_v25  ;;  %v1503_v38 = vpop.trf.xlu1 }
 0x26b   :  { %v1429_v21 = vadd.f32 %v1413_v43, %v1308_v26 }
 0x26c   :  { %v1430_v31 = vadd.f32 %v1414_v57, %v1309_v28  ;;  %1568 = vmatprep.subr.bf16.mxu1 %v1482_v8  ;;  %v1460_v1 = vmin.f32 %v1444_v49, 6.0 }
 0x26d   :  { %v1445_v16 = vmax.f32 %v1429_v21, 0.0  ;;  %1569 = vmatpush1.bf16.msra.mxu1 %v1481_v4 }
 0x26e   :  { %v1446_v35 = vmax.f32 %v1430_v31, 0.0  ;;  %v1476_v53 = vpack.c.bf16 %v1460_v1, %v1456_v56 }
 0x26f   :  { %v1461_v33 = vmin.f32 %v1445_v16, 6.0 }
 0x270   :  { %1529 = vmatprep.subr.bf16.mxu0 %v1476_v53  ;;  %v1462_v48 = vmin.f32 %v1446_v35, 6.0 }
 0x271   :  { %1530 = vmatpush1.bf16.msra.mxu0 %v3678_v32  ;;  %v1477_v0 = vpack.c.bf16 %v1461_v33, %v1457_v11 }
 0x272   :  { %v1478_v51 = vpack.c.bf16 %v1462_v48, %v1458_v30 }
 0x274   :  { %1665 = vmatmul.mubr.msk.bf16.vlgmr.msra.gmra.mxu0 %vm1511_vm2, %v1503_v38  ;;  %1570 = vmatprep.subr.bf16.mxu1 %v1478_v51 }
 0x275   :  { %1571 = vmatpush1.bf16.msra.mxu1 %v1477_v0 }
 0x278   :  { %1666 = vmatmul.mubr.msk.bf16.vlgmr.msra.gmra.mxu1 %vm1511_vm2, %v1503_v38 }
 0x334   :  { %v1549_v58 = vpop.f32.mrf.mxu0 }
 0x335   :  { %v1597_v40 = vadd.f32 %v1549_v58, %v3679_v52 }
 0x336   :  { %v1551_v2 = vpop.f32.mrf.mxu0 }
 0x337   :  { %v1601_v59 = vadd.f32 %v1679_v45, %v1597_v40  ;;  %v1598_v18 = vadd.f32 %v1551_v2, %v3679_v52 }
 0x338   :  { %v1590_v9 = vpop.f32.mrf.mxu1  ;;  %v1553_v7 = vpop.f32.mrf.mxu0 }
 0x339   :  { %1605 = vst [vmem:[#allocation2] sm:$0xff] %v1601_v59  ;;  %v1602_v6 = vadd.f32 %v1680_v19, %v1598_v18  ;;  %v1599_v36 = vadd.f32 %v1590_v9, %v3679_v52 }
 0x33a   :  { %v1592_v23 = vpop.f32.mrf.mxu1  ;;  %v1554_v12 = vpop.f32.mrf.mxu0 }
 0x33b   :  { %1606 = vst [vmem:[#allocation2 + $0x8] sm:$0xff] %v1602_v6  ;;  %v1603_v20 = vadd.f32 %v1681_v3, %v1599_v36  ;;  %v1600_v47 = vadd.f32 %v1592_v23, %v3679_v52 }
 0x33c   :  { %v1594_v61 = vpop.f32.mrf.mxu1 }
 0x33d   :  { %1607 = vst [vmem:[#allocation2 + $0x10] sm:$0xff] %v1603_v20  ;;  %v1604_v44 = vadd.f32 %v1682_v15, %v1600_v47 }
 0x33e   :  { %v1595_v10 = vpop.f32.mrf.mxu1 }
 0x33f   :  { %1608 = vst [vmem:[#allocation2 + $0x18] sm:$0xff] %v1604_v44 }
 0x340   :  { %1694 = shalt.err (!%p1691_p4)
}
 0x341   :  { %1618 = dma.vmem_to_hbm [thread:$0]  %s1616_s1, 512, %s3398_s7, [#allocation3]  }
 0x342   :  { %1703 = dma.done.wait [#allocation3], 512  }
 0x343   :  { %1704 = vsyncadd [#allocation3], 4294966784 }
 0x344   :  { %1622 = vsyncpa [#allocation3], 1 }

</bundles_post_ra>
